<compile_context>
chip_gen: v6e
topology: v6e:2x2x1
jax: 0.10.0
libtpu: 0.0.40
codegen_flags: <defaults>
</compile_context>

<pallas_src>
import math

import jax
import jax.numpy as jnp
from jax.experimental import pallas as pl
from jax.experimental.pallas import tpu as pltpu

FILTERS = (3, 9)          # self.filter_length
F_MAX = max(FILTERS)      # unified tap count, also m_f
P = len(FILTERS)
BN_EPS = 1e-5


# ---------------------------------------------------------------------------
# Kernel 1: Conv1d (both filter scales) + training-mode BatchNorm1d + ELU
# ---------------------------------------------------------------------------
def conv_bn_elu_pallas(X, W, WGT, GB):
    """X  : (2, B, Lp, C)    padded inputs, channels on lanes (Lp = Lmax + 2*(F_MAX//2))
       W  : (2, F_MAX*C, P*C) packed im2col weights (f=3 centre-padded to 9 taps)
       WGT: (2, 1, B*Lmax)   1/(B*L_valid) on valid rows, 0 on padding rows
       GB : (2, P*C)         row 0 = tiled gamma, row 1 = tiled beta
       out: (2, B*Lmax, P*C)
    """
    S, B, Lp, C = X.shape
    Lmax = Lp - 2 * (F_MAX // 2)
    BL = B * Lmax
    PC = P * C
    FC = F_MAX * C

    def kernel(x_ref, w_ref, wgt_ref, gb_ref, y_ref):
        x = x_ref[0]                                      # (B, Lp, C)
        # im2col: lane-axis concat of the F_MAX shifted windows, then a single
        # leading-dim merge.  Channels stay on the lane axis throughout.
        xcol = jnp.concatenate(
            [x[:, tap:tap + Lmax, :] for tap in range(F_MAX)], axis=2)
        xcol = xcol.reshape(BL, FC)                       # (BL, F_MAX*C)
        y = jnp.dot(xcol, w_ref[0],
                    preferred_element_type=jnp.float32)   # (BL, P*C): all filters at once

        # Batch statistics per (filter, channel) over the valid (b, t) rows.
        wgt = wgt_ref[0]                                  # (1, BL)
        mean = jnp.dot(wgt, y, preferred_element_type=jnp.float32)        # (1, P*C)
        mean_sq = jnp.dot(wgt, y * y, preferred_element_type=jnp.float32)
        var = mean_sq - mean * mean                       # biased var (torch training BN)
        inv_std = jax.lax.rsqrt(var + BN_EPS)

        gb = gb_ref[...]                                  # (2, P*C) lane-major
        scale = gb[0:1, :] * inv_std
        shift = gb[1:2, :] - mean * scale
        z = y * scale + shift
        # ELU(alpha=1).  exp(z)-1 instead of expm1 to stay on ops with
        # guaranteed Mosaic lowering; f32 error near z~0 is ~1e-8.
        y_ref[0] = jnp.where(z > 0, z, jnp.exp(z) - 1.0)

    return pl.pallas_call(
        kernel,
        out_shape=jax.ShapeDtypeStruct((S, BL, PC), jnp.float32),
        grid=(S,),
        in_specs=[pl.BlockSpec((1, B, Lp, C), lambda s: (s, 0, 0, 0)),
                  pl.BlockSpec((1, FC, PC), lambda s: (s, 0, 0)),
                  pl.BlockSpec((1, 1, BL), lambda s: (s, 0, 0)),
                  pl.BlockSpec((2, PC), lambda s: (0, 0))],
        out_specs=pl.BlockSpec((1, BL, PC), lambda s: (s, 0, 0)),
        compiler_params=pltpu.CompilerParams(dimension_semantics=("parallel",)),
    )(X, W, WGT, GB)


# ---------------------------------------------------------------------------
# Kernel 2: scores -> softmax(sampled keys) -> max over scales ->
#           closed-form second softmax over the full key axis -> context
# ---------------------------------------------------------------------------
def acat_attention_pallas(Qa, Ka, Va, m_f):
    """Qa : (BH, P, l, d_k)   Ka : (BH, P, l_k, d_k)   Va : (BH, l_k, d_k)
       returns ctx (BH*l, d_k), attn (BH*l, l_k)
    """
    BH, P_, l, dk = Qa.shape
    l_k = Ka.shape[2]
    n_k = -(-l_k // m_f)                     # ceil(l_k / m_f) sampled keys
    nsteps = 2 if BH % 2 == 0 else 1         # keep a 2-way parallel axis for v7x
    G = BH // nsteps
    inv_sqrt_dk = 1.0 / math.sqrt(dk)
    n_zero = float(l_k - n_k)                # number of all-zero key columns

    def kernel(q_ref, k_ref, v_ref, ctx_ref, att_ref):
        q = q_ref[...].reshape(G * P_, l, dk)
        k_all = k_ref[...].reshape(G * P_, l_k, dk)
        # in-VMEM key subsample at positions 0::m_f (static unit slices)
        k_sub = jnp.concatenate(
            [k_all[:, j * m_f:j * m_f + 1, :] for j in range(n_k)], axis=1)  # (G*P, n_k, dk)

        s = jnp.einsum('bqd,bkd->bqk', q, k_sub,
                       preferred_element_type=jnp.float32) * inv_sqrt_dk     # (G*P, l, n_k)
        m1 = jnp.max(s, axis=-1, keepdims=True)
        e1 = jnp.exp(s - m1)
        a1 = e1 * pl.reciprocal(jnp.sum(e1, axis=-1, keepdims=True), approx=True)

        a_max = jnp.max(a1.reshape(G, P_, l, n_k), axis=1)   # max over filter scales
        a2d = a_max.reshape(G * l, n_k)

        # Second softmax over the FULL key axis (zeros everywhere except the
        # sampled columns).  exp() is evaluated only on the n_k sampled
        # columns; the l_k - n_k zero columns contribute exp(0 - m2) in closed
        # form.  The scatter into columns 0::m_f is one selector matmul.
        rows = jax.lax.broadcasted_iota(jnp.int32, (n_k, l_k), 0)
        cols = jax.lax.broadcasted_iota(jnp.int32, (n_k, l_k), 1)
        sel = (cols == rows * m_f).astype(jnp.float32)         # (n_k, l_k)
        col_sampled = jnp.sum(sel, axis=0, keepdims=True)      # (1, l_k) indicator

        m2 = jnp.maximum(jnp.max(a2d, axis=-1, keepdims=True), 0.0)   # (G*l, 1)
        es = jnp.exp(a2d - m2)                                  # (G*l, n_k)
        base = jnp.exp(-m2)                                     # value at zero columns
        numer = (jnp.dot(es, sel, preferred_element_type=jnp.float32)
                 + base * (1.0 - col_sampled))                  # (G*l, l_k)
        denom = jnp.sum(es, axis=-1, keepdims=True) + n_zero * base
        a2 = numer * pl.reciprocal(denom, approx=True)

        att_ref[...] = a2                                       # (G*l, l_k) slab
        ctx = jnp.einsum('gqk,gkd->gqd', a2.reshape(G, l, l_k), v_ref[...],
                         preferred_element_type=jnp.float32)
        ctx_ref[...] = ctx.reshape(G * l, dk)                   # (G*l, d_k) slab

    return pl.pallas_call(
        kernel,
        out_shape=(jax.ShapeDtypeStruct((BH * l, dk), jnp.float32),
                   jax.ShapeDtypeStruct((BH * l, l_k), jnp.float32)),
        grid=(nsteps,),
        in_specs=[pl.BlockSpec((G, P_, l, dk), lambda i: (i, 0, 0, 0)),
                  pl.BlockSpec((G, P_, l_k, dk), lambda i: (i, 0, 0, 0)),
                  pl.BlockSpec((G, l_k, dk), lambda i: (i, 0, 0))],
        out_specs=(pl.BlockSpec((G * l, dk), lambda i: (i, 0)),
                   pl.BlockSpec((G * l, l_k), lambda i: (i, 0))),
        compiler_params=pltpu.CompilerParams(dimension_semantics=("parallel",)),
    )(Qa, Ka, Va)


# ---------------------------------------------------------------------------
# Parameters (torch-layout) and the full forward wrapper
# ---------------------------------------------------------------------------
def init_acat_params(key, d_k, h):
    """Deterministic synthetic parameters matching the module's shapes (torch layouts)."""
    C = h * d_k
    params = {"wq": [], "wk": [],
              "gamma": jnp.ones((C,), jnp.float32),     # BatchNorm1d weight default
              "beta": jnp.zeros((C,), jnp.float32)}     # BatchNorm1d bias default
    for f in FILTERS:
        bound = 1.0 / math.sqrt(C * f)                  # PyTorch Conv1d default init bound
        key, kq, kk = jax.random.split(key, 3)
        # torch Conv1d layout: (C_out, C_in, f)
        params["wq"].append(jax.random.uniform(kq, (C, C, f), jnp.float32,
                                               minval=-bound, maxval=bound))
        params["wk"].append(jax.random.uniform(kk, (C, C, f), jnp.float32,
                                               minval=-bound, maxval=bound))
    return params


def acat_forward(params, Q, K, V):
    b, h, l, d_k = Q.shape
    l_k = K.shape[2]
    C = h * d_k
    m_f = F_MAX
    B = b
    Lmax = max(l, l_k)
    pad = F_MAX // 2
    Lp = Lmax + 2 * pad

    # Raw reshape exactly as in the torch code (row-major reinterpretation of
    # (h, l, d_k) memory as (h*d_k, l) -- matches torch .reshape on contiguous data).
    Qr = Q.reshape(b, C, l)
    Kr = K.reshape(b, C, l_k)

    def prep(x, L):                       # (B, C, L) -> (B, Lp, C), channels on lanes
        xpad = jnp.pad(x, ((0, 0), (0, 0), (pad, pad + (Lmax - L))))
        return jnp.transpose(xpad, (0, 2, 1))

    X = jnp.stack([prep(Qr, l), prep(Kr, l_k)], axis=0)          # (2, B, Lp, C)

    def pack_weights(w_list):
        # torch (C_out, C_in, f) -> im2col (F_MAX*C_in, P*C_out); f=3 centre-padded
        # to F_MAX taps so that padding=F_MAX//2 reproduces padding=f//2 exactly.
        blocks = []
        for w in w_list:
            f = w.shape[-1]
            off = (F_MAX - f) // 2
            wp = jnp.pad(w, ((0, 0), (0, 0), (off, F_MAX - f - off)))
            blocks.append(jnp.transpose(wp, (2, 1, 0)).reshape(F_MAX * C, C))
        return jnp.concatenate(blocks, axis=1)

    W = jnp.stack([pack_weights(params["wq"]), pack_weights(params["wk"])], axis=0)

    def valid_wgt(L):                     # 1/(B*L) on valid (t < L) positions, else 0
        t = jnp.arange(Lmax)
        m = (t < L).astype(jnp.float32) / (B * L)
        return jnp.tile(m, B)             # row index is b*Lmax + t

    WGT = jnp.stack([valid_wgt(l), valid_wgt(l_k)], axis=0)[:, None, :]      # (2, 1, B*Lmax)
    GB = jnp.stack([jnp.tile(params["gamma"], P),
                    jnp.tile(params["beta"], P)], axis=0)                    # (2, P*C)

    A = conv_bn_elu_pallas(X, W, WGT, GB)                        # (2, B*Lmax, P*C)

    def to_torch_stack(a2d, L):
        # -> (P*B, C, L), matching torch.cat([...], dim=0) ordering
        a4 = a2d.reshape(B, Lmax, P, C)
        return jnp.transpose(a4, (2, 0, 3, 1))[:, :, :, :L].reshape(P * B, C, L)

    # Raw torch-style reinterpretation into (b, h, P, len, d_k).
    Q_p = to_torch_stack(A[0], l).reshape(b, h, P, l, d_k)
    K_tmp = to_torch_stack(A[1], l_k).reshape(b, h, P, l_k, d_k)

    BH = b * h
    ctx2d, att2d = acat_attention_pallas(Q_p.reshape(BH, P, l, d_k),
                                         K_tmp.reshape(BH, P, l_k, d_k),
                                         V.reshape(BH, l_k, d_k),
                                         m_f)
    return ctx2d.reshape(b, h, l, d_k), att2d.reshape(b, h, l, l_k)


# ---------------------------------------------------------------------------
# Pure-JAX reference (faithful port of the torch forward) for self-check
# ---------------------------------------------------------------------------
def acat_forward_ref(params, Q, K, V):
    b, h, l, d_k = Q.shape
    l_k = K.shape[2]
    C = h * d_k
    m_f = F_MAX
    hp = jax.lax.Precision.HIGHEST

    def conv1d(x, w, pad):                 # x: (b, C, L), w: (Cout, Cin, f)
        return jax.lax.conv_general_dilated(
            x, w, window_strides=(1,), padding=[(pad, pad)],
            dimension_numbers=('NCH', 'OIH', 'NCH'), precision=hp)

    def bn_elu(y):                          # training-mode BN + ELU(alpha=1)
        mean = jnp.mean(y, axis=(0, 2), keepdims=True)
        var = jnp.mean((y - mean) ** 2, axis=(0, 2), keepdims=True)
        z = ((y - mean) * jax.lax.rsqrt(var + BN_EPS)
             * params["gamma"][None, :, None] + params["beta"][None, :, None])
        return jnp.where(z > 0, z, jnp.expm1(z))

    Qr = Q.reshape(b, C, l)
    Kr = K.reshape(b, C, l_k)
    Q_l = [bn_elu(conv1d(Qr, params["wq"][i], FILTERS[i] // 2))[:, :, :l]
           for i in range(P)]
    K_l = [bn_elu(conv1d(Kr, params["wk"][i], FILTERS[i] // 2))[:, :, :l_k]
           for i in range(P)]
    Q_p = jnp.concatenate(Q_l, axis=0).reshape(b, h, P, l, d_k)
    K_tmp = jnp.concatenate(K_l, axis=0).reshape(b, h, P, l_k, d_k)
    K_p = K_tmp[:, :, :, 0::m_f, :]
    scores = jnp.einsum('bhpqd,bhpkd->bhpqk', Q_p, K_p, precision=hp) / math.sqrt(d_k)
    attn = jax.nn.softmax(scores, axis=-1)
    attn = jnp.max(attn, axis=2)
    attn_f = jnp.zeros((b, h, l, l_k), jnp.float32).at[:, :, :, 0::m_f].set(attn)
    attn_f = jax.nn.softmax(attn_f, axis=-1)
    context = jnp.einsum('bhqk,bhkd->bhqd', attn_f, V, precision=hp)
    return context, attn_f


if __name__ == "__main__":
    b, h, l, d_k = 2, 2, 16, 16
    l_k = 16
    key = jax.random.PRNGKey(0)
    kq, kk, kv, kp = jax.random.split(key, 4)
    Q = jax.random.normal(kq, (b, h, l, d_k), jnp.float32)
    K = jax.random.normal(kk, (b, h, l_k, d_k), jnp.float32)
    V = jax.random.normal(kv, (b, h, l_k, d_k), jnp.float32)
    params = init_acat_params(kp, d_k, h)

    context, attn_f = jax.jit(acat_forward)(params, Q, K, V)
    jax.block_until_ready((context, attn_f))
    assert context.shape == (b, h, l, d_k)
    assert attn_f.shape == (b, h, l, l_k)
    assert bool(jnp.all(jnp.isfinite(context))) and bool(jnp.all(jnp.isfinite(attn_f)))

    # Correctness self-check against a pure-JAX port of the torch forward.
    ctx_ref, att_ref = jax.jit(acat_forward_ref)(params, Q, K, V)
    assert bool(jnp.allclose(context, ctx_ref, rtol=2e-2, atol=2e-2))
    assert bool(jnp.allclose(attn_f, att_ref, rtol=2e-2, atol=2e-2))
    print("KERNEL_OK")
</pallas_src>

<mosaic_0001>
module attributes {stable_mosaic.version = 11 : i64} {
  func.func @kernel(%arg0: i32, %arg1: memref<1x2x24x32xf32, #tpu.memory_space<vmem>>, %arg2: memref<1x288x64xf32, #tpu.memory_space<vmem>>, %arg3: memref<1x1x32xf32, #tpu.memory_space<vmem>>, %arg4: memref<2x64xf32, #tpu.memory_space<vmem>>, %arg5: memref<1x32x64xf32, #tpu.memory_space<vmem>>) attributes {dimension_semantics = [#tpu.dimension_semantics<parallel>], iteration_bounds = array<i64: 2>, scalar_prefetch = 0 : i64, scratch_operands = 0 : i64, tpu.core_type = #tpu.core_type<tc>, window_params = [{transform_indices = @transform_0, window_bounds = array<i64: 1, 2, 24, 32>}, {transform_indices = @transform_1, window_bounds = array<i64: 1, 288, 64>}, {transform_indices = @transform_2, window_bounds = array<i64: 1, 1, 32>}, {pipeline_mode = #tpu.pipeline_mode<synchronous>, transform_indices = @transform_3, window_bounds = array<i64: 2, 64>}, {transform_indices = @transform_4, window_bounds = array<i64: 1, 32, 64>}]} {
    %c0 = arith.constant 0 : index
    %c0_0 = arith.constant 0 : index
    %c0_1 = arith.constant 0 : index
    %c0_2 = arith.constant 0 : index
    %0 = vector.load %arg1[%c0, %c0_0, %c0_1, %c0_2] : memref<1x2x24x32xf32, #tpu.memory_space<vmem>>, vector<1x2x24x32xf32>
    %1 = vector.shape_cast %0 : vector<1x2x24x32xf32> to vector<2x24x32xf32>
    %2 = vector.extract_strided_slice %1 {offsets = [0, 0, 0], sizes = [2, 16, 32], strides = [1, 1, 1]} : vector<2x24x32xf32> to vector<2x16x32xf32>
    %3 = vector.extract_strided_slice %1 {offsets = [0, 1, 0], sizes = [2, 16, 32], strides = [1, 1, 1]} : vector<2x24x32xf32> to vector<2x16x32xf32>
    %4 = vector.extract_strided_slice %1 {offsets = [0, 2, 0], sizes = [2, 16, 32], strides = [1, 1, 1]} : vector<2x24x32xf32> to vector<2x16x32xf32>
    %5 = vector.extract_strided_slice %1 {offsets = [0, 3, 0], sizes = [2, 16, 32], strides = [1, 1, 1]} : vector<2x24x32xf32> to vector<2x16x32xf32>
    %6 = vector.extract_strided_slice %1 {offsets = [0, 4, 0], sizes = [2, 16, 32], strides = [1, 1, 1]} : vector<2x24x32xf32> to vector<2x16x32xf32>
    %7 = vector.extract_strided_slice %1 {offsets = [0, 5, 0], sizes = [2, 16, 32], strides = [1, 1, 1]} : vector<2x24x32xf32> to vector<2x16x32xf32>
    %8 = vector.extract_strided_slice %1 {offsets = [0, 6, 0], sizes = [2, 16, 32], strides = [1, 1, 1]} : vector<2x24x32xf32> to vector<2x16x32xf32>
    %9 = vector.extract_strided_slice %1 {offsets = [0, 7, 0], sizes = [2, 16, 32], strides = [1, 1, 1]} : vector<2x24x32xf32> to vector<2x16x32xf32>
    %10 = vector.extract_strided_slice %1 {offsets = [0, 8, 0], sizes = [2, 16, 32], strides = [1, 1, 1]} : vector<2x24x32xf32> to vector<2x16x32xf32>
    %11 = tpu.concatenate %2, %3, %4, %5, %6, %7, %8, %9, %10 in 2 : vector<2x16x32xf32>, vector<2x16x32xf32>, vector<2x16x32xf32>, vector<2x16x32xf32>, vector<2x16x32xf32>, vector<2x16x32xf32>, vector<2x16x32xf32>, vector<2x16x32xf32>, vector<2x16x32xf32> -> vector<2x16x288xf32>
    %12 = vector.shape_cast %11 : vector<2x16x288xf32> to vector<32x288xf32>
    %c0_3 = arith.constant 0 : index
    %c0_4 = arith.constant 0 : index
    %c0_5 = arith.constant 0 : index
    %13 = vector.load %arg2[%c0_3, %c0_4, %c0_5] : memref<1x288x64xf32, #tpu.memory_space<vmem>>, vector<1x288x64xf32>
    %14 = vector.shape_cast %13 : vector<1x288x64xf32> to vector<288x64xf32>
    %cst = arith.constant dense<0.000000e+00> : vector<32x64xf32>
    %15 = tpu.matmul %12, %14, %cst {dimension_numbers = #tpu.dot_dimension_numbers<[1], [0], [0], [1], [0, 0, 1, 1], [], []>} : vector<32x288xf32>, vector<288x64xf32>, vector<32x64xf32> -> vector<32x64xf32>
    %c0_6 = arith.constant 0 : index
    %c0_7 = arith.constant 0 : index
    %c0_8 = arith.constant 0 : index
    %16 = vector.load %arg3[%c0_6, %c0_7, %c0_8] : memref<1x1x32xf32, #tpu.memory_space<vmem>>, vector<1x1x32xf32>
    %17 = vector.shape_cast %16 : vector<1x1x32xf32> to vector<1x32xf32>
    %cst_9 = arith.constant dense<0.000000e+00> : vector<1x64xf32>
    %18 = tpu.matmul %17, %15, %cst_9 {dimension_numbers = #tpu.dot_dimension_numbers<[1], [0], [0], [1], [0, 0, 1, 1], [], []>} : vector<1x32xf32>, vector<32x64xf32>, vector<1x64xf32> -> vector<1x64xf32>
    %19 = arith.mulf %15, %15 : vector<32x64xf32>
    %cst_10 = arith.constant dense<0.000000e+00> : vector<1x64xf32>
    %20 = tpu.matmul %17, %19, %cst_10 {dimension_numbers = #tpu.dot_dimension_numbers<[1], [0], [0], [1], [0, 0, 1, 1], [], []>} : vector<1x32xf32>, vector<32x64xf32>, vector<1x64xf32> -> vector<1x64xf32>
    %21 = arith.mulf %18, %18 : vector<1x64xf32>
    %22 = arith.subf %20, %21 : vector<1x64xf32>
    %cst_11 = arith.constant 9.99999974E-6 : f32
    %23 = vector.broadcast %cst_11 : f32 to vector<1x64xf32>
    %24 = arith.addf %22, %23 : vector<1x64xf32>
    %25 = math.rsqrt %24 : vector<1x64xf32>
    %c0_12 = arith.constant 0 : index
    %c0_13 = arith.constant 0 : index
    %26 = vector.load %arg4[%c0_12, %c0_13] : memref<2x64xf32, #tpu.memory_space<vmem>>, vector<2x64xf32>
    %27 = vector.extract_strided_slice %26 {offsets = [0, 0], sizes = [1, 64], strides = [1, 1]} : vector<2x64xf32> to vector<1x64xf32>
    %28 = arith.mulf %27, %25 : vector<1x64xf32>
    %29 = vector.extract_strided_slice %26 {offsets = [1, 0], sizes = [1, 64], strides = [1, 1]} : vector<2x64xf32> to vector<1x64xf32>
    %30 = arith.mulf %18, %28 : vector<1x64xf32>
    %31 = arith.subf %29, %30 : vector<1x64xf32>
    %32 = vector.broadcast %28 : vector<1x64xf32> to vector<32x64xf32>
    %33 = arith.mulf %15, %32 : vector<32x64xf32>
    %34 = vector.broadcast %31 : vector<1x64xf32> to vector<32x64xf32>
    %35 = arith.addf %33, %34 : vector<32x64xf32>
    %cst_14 = arith.constant 0.000000e+00 : f32
    %36 = vector.broadcast %cst_14 : f32 to vector<32x64xf32>
    %37 = arith.cmpf ogt, %35, %36 : vector<32x64xf32>
    %38 = math.exp %35 : vector<32x64xf32>
    %cst_15 = arith.constant 1.000000e+00 : f32
    %39 = vector.broadcast %cst_15 : f32 to vector<32x64xf32>
    %40 = arith.subf %38, %39 : vector<32x64xf32>
    %41 = arith.select %37, %35, %40 : vector<32x64xi1>, vector<32x64xf32>
    %c0_16 = arith.constant 0 : index
    %c0_17 = arith.constant 0 : index
    %c0_18 = arith.constant 0 : index
    %42 = vector.load %arg5[%c0_16, %c0_17, %c0_18] : memref<1x32x64xf32, #tpu.memory_space<vmem>>, vector<1x32x64xf32>
    %43 = vector.shape_cast %42 : vector<1x32x64xf32> to vector<32x64xf32>
    %44 = vector.shape_cast %41 : vector<32x64xf32> to vector<1x32x64xf32>
    tpu.vector_store %arg5[%c0_16, %c0_17, %c0_18], %44 {strides = array<i32>} : memref<1x32x64xf32, #tpu.memory_space<vmem>>, vector<1x32x64xf32>,
    return
  }
  func.func @transform_0(%arg0: i32) -> (i32, i32, i32, i32) {
    %c0_i32 = arith.constant 0 : i32
    %c0_i32_0 = arith.constant 0 : i32
    %c0_i32_1 = arith.constant 0 : i32
    %c0_i32_2 = arith.constant 0 : i32
    return %arg0, %c0_i32, %c0_i32_0, %c0_i32_1 : i32, i32, i32, i32
  }
  func.func @transform_1(%arg0: i32) -> (i32, i32, i32) {
    %c0_i32 = arith.constant 0 : i32
    %c0_i32_0 = arith.constant 0 : i32
    %c0_i32_1 = arith.constant 0 : i32
    return %arg0, %c0_i32, %c0_i32_0 : i32, i32, i32
  }
  func.func @transform_2(%arg0: i32) -> (i32, i32, i32) {
    %c0_i32 = arith.constant 0 : i32
    %c0_i32_0 = arith.constant 0 : i32
    %c0_i32_1 = arith.constant 0 : i32
    return %arg0, %c0_i32, %c0_i32_0 : i32, i32, i32
  }
  func.func @transform_3(%arg0: i32) -> (i32, i32) {
    %c0_i32 = arith.constant 0 : i32
    %c0_i32_0 = arith.constant 0 : i32
    %c0_i32_1 = arith.constant 0 : i32
    return %c0_i32, %c0_i32_0 : i32, i32
  }
  func.func @transform_4(%arg0: i32) -> (i32, i32, i32) {
    %c0_i32 = arith.constant 0 : i32
    %c0_i32_0 = arith.constant 0 : i32
    %c0_i32_1 = arith.constant 0 : i32
    return %arg0, %c0_i32, %c0_i32_0 : i32, i32, i32
  }
}

module attributes {stable_mosaic.version = 11 : i64} {
  func.func @kernel(%arg0: i32, %arg1: memref<2x2x16x16xf32, #tpu.memory_space<vmem>>, %arg2: memref<2x2x16x16xf32, #tpu.memory_space<vmem>>, %arg3: memref<2x16x16xf32, #tpu.memory_space<vmem>>, %arg4: memref<32x16xf32, #tpu.memory_space<vmem>>, %arg5: memref<32x16xf32, #tpu.memory_space<vmem>>) attributes {dimension_semantics = [#tpu.dimension_semantics<parallel>], iteration_bounds = array<i64: 2>, scalar_prefetch = 0 : i64, scratch_operands = 0 : i64, tpu.core_type = #tpu.core_type<tc>, window_params = [{transform_indices = @transform_0, window_bounds = array<i64: 2, 2, 16, 16>}, {transform_indices = @transform_1, window_bounds = array<i64: 2, 2, 16, 16>}, {transform_indices = @transform_2, window_bounds = array<i64: 2, 16, 16>}, {transform_indices = @transform_3, window_bounds = array<i64: 32, 16>}, {transform_indices = @transform_4, window_bounds = array<i64: 32, 16>}]} {
    %c0 = arith.constant 0 : index
    %c0_0 = arith.constant 0 : index
    %c0_1 = arith.constant 0 : index
    %c0_2 = arith.constant 0 : index
    %0 = vector.load %arg1[%c0, %c0_0, %c0_1, %c0_2] : memref<2x2x16x16xf32, #tpu.memory_space<vmem>>, vector<2x2x16x16xf32>
    %1 = vector.shape_cast %0 : vector<2x2x16x16xf32> to vector<4x16x16xf32>
    %c0_3 = arith.constant 0 : index
    %c0_4 = arith.constant 0 : index
    %c0_5 = arith.constant 0 : index
    %c0_6 = arith.constant 0 : index
    %2 = vector.load %arg2[%c0_3, %c0_4, %c0_5, %c0_6] : memref<2x2x16x16xf32, #tpu.memory_space<vmem>>, vector<2x2x16x16xf32>
    %3 = vector.shape_cast %2 : vector<2x2x16x16xf32> to vector<4x16x16xf32>
    %4 = vector.extract_strided_slice %3 {offsets = [0, 0, 0], sizes = [4, 1, 16], strides = [1, 1, 1]} : vector<4x16x16xf32> to vector<4x1x16xf32>
    %5 = vector.extract_strided_slice %3 {offsets = [0, 9, 0], sizes = [4, 1, 16], strides = [1, 1, 1]} : vector<4x16x16xf32> to vector<4x1x16xf32>
    %6 = tpu.concatenate %4, %5 in 1 : vector<4x1x16xf32>, vector<4x1x16xf32> -> vector<4x2x16xf32>
    "tpu.trace_start"() <{level = 10 : i32, message = "bqd,bkd->bqk"}> : () -> ()
    %cst = arith.constant dense<0.000000e+00> : vector<4x16x2xf32>
    %7 = tpu.matmul %1, %6, %cst {dimension_numbers = #tpu.dot_dimension_numbers<[2], [2], [1], [1], [0, 0, 0, 1, 1, 1], [0], [0]>} : vector<4x16x16xf32>, vector<4x2x16xf32>, vector<4x16x2xf32> -> vector<4x16x2xf32>
    "tpu.trace_stop"() : () -> ()
    %cst_7 = arith.constant 2.500000e-01 : f32
    %8 = vector.broadcast %cst_7 : f32 to vector<4x16x2xf32>
    %9 = arith.mulf %7, %8 : vector<4x16x2xf32>
    %cst_8 = arith.constant dense<0xFF800000> : vector<4x16xf32>
    %10 = vector.multi_reduction <maximumf>, %9, %cst_8 [2] : vector<4x16x2xf32> to vector<4x16xf32>
    %11 = vector.shape_cast %10 : vector<4x16xf32> to vector<4x16x1xf32>
    %12 = vector.broadcast %11 : vector<4x16x1xf32> to vector<4x16x2xf32>
    %13 = arith.subf %9, %12 : vector<4x16x2xf32>
    %14 = math.exp %13 : vector<4x16x2xf32>
    %cst_9 = arith.constant dense<0.000000e+00> : vector<4x16xf32>
    %15 = vector.multi_reduction <add>, %14, %cst_9 [2] : vector<4x16x2xf32> to vector<4x16xf32>
    %16 = vector.shape_cast %15 : vector<4x16xf32> to vector<4x16x1xf32>
    %17 = tpu.reciprocal %16 {approx = true} : vector<4x16x1xf32> -> vector<4x16x1xf32>
    %18 = vector.broadcast %17 : vector<4x16x1xf32> to vector<4x16x2xf32>
    %19 = arith.mulf %14, %18 : vector<4x16x2xf32>
    %20 = vector.shape_cast %19 : vector<4x16x2xf32> to vector<2x2x16x2xf32>
    %cst_10 = arith.constant dense<0xFF800000> : vector<2x16x2xf32>
    %21 = vector.multi_reduction <maximumf>, %20, %cst_10 [1] : vector<2x2x16x2xf32> to vector<2x16x2xf32>
    %22 = vector.shape_cast %21 : vector<2x16x2xf32> to vector<32x2xf32>
    %23 = tpu.iota {dimensions = array<i32: 0>} : vector<2x16xi32>
    %24 = tpu.iota {dimensions = array<i32: 1>} : vector<2x16xi32>
    %c9_i32 = arith.constant 9 : i32
    %25 = vector.broadcast %c9_i32 : i32 to vector<2x16xi32>
    %26 = arith.muli %23, %25 : vector<2x16xi32>
    %27 = arith.cmpi eq, %24, %26 : vector<2x16xi32>
    %28 = arith.extui %27 : vector<2x16xi1> to vector<2x16xi32>
    %29 = arith.sitofp %28 : vector<2x16xi32> to vector<2x16xf32>
    %cst_11 = arith.constant dense<0.000000e+00> : vector<16xf32>
    %30 = vector.multi_reduction <add>, %29, %cst_11 [0] : vector<2x16xf32> to vector<16xf32>
    %31 = vector.shape_cast %30 : vector<16xf32> to vector<1x16xf32>
    %cst_12 = arith.constant dense<0xFF800000> : vector<32xf32>
    %32 = vector.multi_reduction <maximumf>, %22, %cst_12 [1] : vector<32x2xf32> to vector<32xf32>
    %33 = vector.shape_cast %32 : vector<32xf32> to vector<32x1xf32>
    %cst_13 = arith.constant 0.000000e+00 : f32
    %34 = vector.broadcast %cst_13 : f32 to vector<32x1xf32>
    %35 = arith.maximumf %33, %34 : vector<32x1xf32>
    %36 = vector.broadcast %35 : vector<32x1xf32> to vector<32x2xf32>
    %37 = arith.subf %22, %36 : vector<32x2xf32>
    %38 = math.exp %37 : vector<32x2xf32>
    %cst_14 = arith.constant 0.000000e+00 : f32
    %39 = vector.broadcast %cst_14 : f32 to vector<32x1xf32>
    %40 = arith.subf %39, %35 : vector<32x1xf32>
    %41 = math.exp %40 : vector<32x1xf32>
    %cst_15 = arith.constant dense<0.000000e+00> : vector<32x16xf32>
    %42 = tpu.matmul %38, %29, %cst_15 {dimension_numbers = #tpu.dot_dimension_numbers<[1], [0], [0], [1], [0, 0, 1, 1], [], []>} : vector<32x2xf32>, vector<2x16xf32>, vector<32x16xf32> -> vector<32x16xf32>
    %cst_16 = arith.constant 1.000000e+00 : f32
    %43 = vector.broadcast %cst_16 : f32 to vector<1x16xf32>
    %44 = arith.subf %43, %31 : vector<1x16xf32>
    %45 = vector.broadcast %41 : vector<32x1xf32> to vector<32x16xf32>
    %46 = vector.broadcast %44 : vector<1x16xf32> to vector<32x16xf32>
    %47 = arith.mulf %45, %46 : vector<32x16xf32>
    %48 = arith.addf %42, %47 : vector<32x16xf32>
    %cst_17 = arith.constant dense<0.000000e+00> : vector<32xf32>
    %49 = vector.multi_reduction <add>, %38, %cst_17 [1] : vector<32x2xf32> to vector<32xf32>
    %50 = vector.shape_cast %49 : vector<32xf32> to vector<32x1xf32>
    %cst_18 = arith.constant 1.400000e+01 : f32
    %51 = vector.broadcast %cst_18 : f32 to vector<32x1xf32>
    %52 = arith.mulf %51, %41 : vector<32x1xf32>
    %53 = arith.addf %50, %52 : vector<32x1xf32>
    %54 = tpu.reciprocal %53 {approx = true} : vector<32x1xf32> -> vector<32x1xf32>
    %55 = vector.broadcast %54 : vector<32x1xf32> to vector<32x16xf32>
    %56 = arith.mulf %48, %55 : vector<32x16xf32>
    %c0_19 = arith.constant 0 : index
    %c0_20 = arith.constant 0 : index
    %57 = vector.load %arg5[%c0_19, %c0_20] : memref<32x16xf32, #tpu.memory_space<vmem>>, vector<32x16xf32>
    tpu.vector_store %arg5[%c0_19, %c0_20], %56 {strides = array<i32>} : memref<32x16xf32, #tpu.memory_space<vmem>>, vector<32x16xf32>,
    %58 = vector.shape_cast %56 : vector<32x16xf32> to vector<2x16x16xf32>
    %c0_21 = arith.constant 0 : index
    %c0_22 = arith.constant 0 : index
    %c0_23 = arith.constant 0 : index
    %59 = vector.load %arg3[%c0_21, %c0_22, %c0_23] : memref<2x16x16xf32, #tpu.memory_space<vmem>>, vector<2x16x16xf32>
    "tpu.trace_start"() <{level = 10 : i32, message = "gqk,gkd->gqd"}> : () -> ()
    %cst_24 = arith.constant dense<0.000000e+00> : vector<2x16x16xf32>
    %60 = tpu.matmul %58, %59, %cst_24 {dimension_numbers = #tpu.dot_dimension_numbers<[2], [1], [1], [2], [0, 0, 0, 1, 1, 2], [0], [0]>} : vector<2x16x16xf32>, vector<2x16x16xf32>, vector<2x16x16xf32> -> vector<2x16x16xf32>
    "tpu.trace_stop"() : () -> ()
    %61 = vector.shape_cast %60 : vector<2x16x16xf32> to vector<32x16xf32>
    %c0_25 = arith.constant 0 : index
    %c0_26 = arith.constant 0 : index
    %62 = vector.load %arg4[%c0_25, %c0_26] : memref<32x16xf32, #tpu.memory_space<vmem>>, vector<32x16xf32>
    tpu.vector_store %arg4[%c0_25, %c0_26], %61 {strides = array<i32>} : memref<32x16xf32, #tpu.memory_space<vmem>>, vector<32x16xf32>,
    return
  }
  func.func @transform_0(%arg0: i32) -> (i32, i32, i32, i32) {
    %c0_i32 = arith.constant 0 : i32
    %c0_i32_0 = arith.constant 0 : i32
    %c0_i32_1 = arith.constant 0 : i32
    %c0_i32_2 = arith.constant 0 : i32
    return %arg0, %c0_i32, %c0_i32_0, %c0_i32_1 : i32, i32, i32, i32
  }
  func.func @transform_1(%arg0: i32) -> (i32, i32, i32, i32) {
    %c0_i32 = arith.constant 0 : i32
    %c0_i32_0 = arith.constant 0 : i32
    %c0_i32_1 = arith.constant 0 : i32
    %c0_i32_2 = arith.constant 0 : i32
    return %arg0, %c0_i32, %c0_i32_0, %c0_i32_1 : i32, i32, i32, i32
  }
  func.func @transform_2(%arg0: i32) -> (i32, i32, i32) {
    %c0_i32 = arith.constant 0 : i32
    %c0_i32_0 = arith.constant 0 : i32
    %c0_i32_1 = arith.constant 0 : i32
    return %arg0, %c0_i32, %c0_i32_0 : i32, i32, i32
  }
  func.func @transform_3(%arg0: i32) -> (i32, i32) {
    %c0_i32 = arith.constant 0 : i32
    %c0_i32_0 = arith.constant 0 : i32
    return %arg0, %c0_i32 : i32, i32
  }
  func.func @transform_4(%arg0: i32) -> (i32, i32) {
    %c0_i32 = arith.constant 0 : i32
    %c0_i32_0 = arith.constant 0 : i32
    return %arg0, %c0_i32 : i32, i32
  }
}

</mosaic_0001>

<bundles_post_ra>
// kernel: tile.33
= control target key start
LH: loop header
LB: loop body
LE: loop exit
PB: predicated region body
PF: predicated region fallthrough
CT: control target
= control target key end

     0   :  { %s22_s0 = inlined_call_operand.vmem [shape: f32[32], index: 0, kind: input, shape index: {}]   ;;  %s23_s1 = inlined_call_operand.vmem [shape: f32[2,32], index: 1, kind: output, shape index: {}]  }
   0x1   :  { %v4_v0 = vld [vmem:[%s22_s0] ss:$0 sm:$0xff] }
   0x2   :  { %5 = vst [vmem:[%s23_s1] sm:$0x3] %v4_v0 }

// kernel: tile.38
= control target key start
LH: loop header
LB: loop body
LE: loop exit
PB: predicated region body
PF: predicated region fallthrough
CT: control target
= control target key end

     0   :  { %vm8_vm0 = vcmask 261120   ;;  %vm14_vm1 = vcmask 523520   ;;  %s42_s0 = inlined_call_operand.vmem [shape: f32[2,32], index: 0, kind: input, shape index: {}]   ;;  %s43_s1 = inlined_call_operand.vmem [shape: f32[1,64], index: 1, kind: output, shape index: {}]  }
   0x1   :  { %v5_v0 = vld [vmem:[%s42_s0] sm:$0x3]  ;;  %s25_s0 = smov 32  }
   0x2   :  { %6 = vst [vmem:[#allocation1] sm:$0x3] %v5_v0 }
   0x9   :  { %v11_v1 = vld [vmem:[#allocation1 + $0x1] sm:$0x1]   ;;  %v7_v2 = vld [vmem:[#allocation1] sm:$0x1]  }
   0xa   :  { %12 = vrot.lane.b32.xlu0 %v11_v1, %s25_s0  ;;  %9 = vst.msk [vmem:[#allocation0] sm:$0x1] %vm8_vm0, %v7_v2  }
  0x7c   :  { %v13_v3 = vpop.permute.xlu0 %12  }
  0x7d   :  { %15 = vst.msk [vmem:[#allocation0] sm:$0x1] %vm14_vm1, %v13_v3  }
  0x84   :  { %v20_v4 = vld [vmem:[#allocation0] sm:$0x1] }
  0x85   :  { %23 = vst [vmem:[%s43_s1] sm:$0x1] %v20_v4 }

// kernel: tile.23
= control target key start
LH: loop header
LB: loop body
LE: loop exit
PB: predicated region body
PF: predicated region fallthrough
CT: control target
= control target key end

     0   :  { %s22_s0 = inlined_call_operand.vmem [shape: f32[16], index: 0, kind: input, shape index: {}]   ;;  %s23_s1 = inlined_call_operand.vmem [shape: f32[2,16], index: 1, kind: output, shape index: {}]  }
   0x1   :  { %v4_v0 = vld [vmem:[%s22_s0] ss:$0 sm:$0xff] }
   0x2   :  { %5 = vst [vmem:[%s23_s1] sm:$0x3] %v4_v0 }

// kernel: tile.28
= control target key start
LH: loop header
LB: loop body
LE: loop exit
PB: predicated region body
PF: predicated region fallthrough
CT: control target
= control target key end

     0   :  { %vm8_vm0 = vcmask 130048   ;;  %vm14_vm1 = vcmask 261248   ;;  %s42_s0 = inlined_call_operand.vmem [shape: f32[2,16], index: 0, kind: input, shape index: {}]   ;;  %s43_s1 = inlined_call_operand.vmem [shape: f32[1,32], index: 1, kind: output, shape index: {}]  }
   0x1   :  { %v5_v0 = vld [vmem:[%s42_s0] sm:$0x3]  ;;  %s25_s0 = smov 16  }
   0x2   :  { %6 = vst [vmem:[#allocation1] sm:$0x3] %v5_v0 }
   0x9   :  { %v11_v1 = vld [vmem:[#allocation1 + $0x1] sm:$0x1]   ;;  %v7_v2 = vld [vmem:[#allocation1] sm:$0x1]  }
   0xa   :  { %12 = vrot.lane.b32.xlu0 %v11_v1, %s25_s0  ;;  %9 = vst.msk [vmem:[#allocation0] sm:$0x1] %vm8_vm0, %v7_v2  }
  0x7c   :  { %v13_v3 = vpop.permute.xlu0 %12  }
  0x7d   :  { %15 = vst.msk [vmem:[#allocation0] sm:$0x1] %vm14_vm1, %v13_v3  }
  0x84   :  { %v20_v4 = vld [vmem:[#allocation0] sm:$0x1] }
  0x85   :  { %23 = vst [vmem:[%s43_s1] sm:$0x1] %v20_v4 }

// kernel: squeeze.2
= control target key start
LH: loop header
LB: loop body
LE: loop exit
PB: predicated region body
PF: predicated region fallthrough
CT: control target
= control target key end

     0   :  { %vm3_vm0 = vcmask 261120   ;;  %s354_s12 = smov 96   ;;  %s489_s0 = inlined_call_operand.vmem [shape: f32[1,32,64], index: 0, kind: input, shape index: {}]   ;;  %s490_s1 = inlined_call_operand.vmem [shape: f32[2,16,2,32], index: 1, kind: output, shape index: {}]  }
   0x1   :  { %v320_v0 = vld [vmem:[%s489_s0 + $0x10] sm:$0xff]   ;;  %v27_v1 = vld [vmem:[%s489_s0] sm:$0xff]   ;;  %v321_v2 = vld [vmem:[%s489_s0 + $0x18] sm:$0xff]  }
   0x2   :  { %46 = vrot.lane.b32.xlu1 %v320_v0, %s354_s12  ;;  %28 = vrot.lane.b32.xlu0 %v27_v1, %s354_s12  ;;  %v319_v3 = vld [vmem:[%s489_s0 + $0x8] sm:$0xff]   ;;  %17 = vst.msk [vmem:[#allocation0 + $0x80] ss:$8 sm:$0xf] %vm3_vm0, %v320_v0  }
   0x3   :  { %19 = vst.msk [vmem:[#allocation0 + $0x80] ss:$8 sm:$0xf0] %vm3_vm0, %v320_v0   ;;  %4 = vst.msk [vmem:[#allocation0] ss:$8 sm:$0xf] %vm3_vm0, %v27_v1  }
   0x4   :  { %5 = vst.msk [vmem:[#allocation0] ss:$8 sm:$0xf0] %vm3_vm0, %v27_v1   ;;  %24 = vst.msk [vmem:[#allocation0 + $0xc0] ss:$8 sm:$0xf] %vm3_vm0, %v321_v2  }
   0x5   :  { %26 = vst.msk [vmem:[#allocation0 + $0xc0] ss:$8 sm:$0xf0] %vm3_vm0, %v321_v2   ;;  %10 = vst.msk [vmem:[#allocation0 + $0x40] ss:$8 sm:$0xf] %vm3_vm0, %v319_v3  }
   0x6   :  { %12 = vst.msk [vmem:[#allocation0 + $0x40] ss:$8 sm:$0xf0] %vm3_vm0, %v319_v3   ;;  %55 = vrot.lane.b32.xlu1 %v321_v2, %s354_s12  ;;  %37 = vrot.lane.b32.xlu0 %v319_v3, %s354_s12 }
  0x74   :  { %v47_v4 = vpop.permute.xlu1 %46   ;;  %v29_v5 = vpop.permute.xlu0 %28  }
  0x75   :  { %50 = vst.msk [vmem:[#allocation0 + $0x81] ss:$8 sm:$0xf] %vm3_vm0, %v47_v4   ;;  %52 = vst.msk [vmem:[#allocation0 + $0x81] ss:$8 sm:$0xf0] %vm3_vm0, %v47_v4  }
  0x76   :  { %32 = vst.msk [vmem:[#allocation0 + $0x1] ss:$8 sm:$0xf] %vm3_vm0, %v29_v5   ;;  %34 = vst.msk [vmem:[#allocation0 + $0x1] ss:$8 sm:$0xf0] %vm3_vm0, %v29_v5  }
  0x78   :  { %v56_v6 = vpop.permute.xlu1 %55   ;;  %v38_v7 = vpop.permute.xlu0 %37  }
  0x79   :  { %59 = vst.msk [vmem:[#allocation0 + $0xc1] ss:$8 sm:$0xf] %vm3_vm0, %v56_v6   ;;  %61 = vst.msk [vmem:[#allocation0 + $0xc1] ss:$8 sm:$0xf0] %vm3_vm0, %v56_v6  }
  0x7a   :  { %41 = vst.msk [vmem:[#allocation0 + $0x41] ss:$8 sm:$0xf] %vm3_vm0, %v38_v7   ;;  %43 = vst.msk [vmem:[#allocation0 + $0x41] ss:$8 sm:$0xf0] %vm3_vm0, %v38_v7  }
  0x7c   :  { %v175_v8 = vld [vmem:[#allocation0 + $0x80] sm:$0x3]  ;;  %v182_v9 = vld [vmem:[#allocation0 + $0x88] sm:$0x3]  ;;  %v189_v10 = vld [vmem:[#allocation0 + $0x90] sm:$0x3] }
  0x7d   :  { %337 = vst [vmem:[%s490_s1 + $0x20] sm:$0x3] %v175_v8  ;;  %338 = vst [vmem:[%s490_s1 + $0x22] sm:$0x3] %v182_v9  ;;  %v196_v11 = vld [vmem:[#allocation0 + $0x98] sm:$0x3] }
  0x7e   :  { %339 = vst [vmem:[%s490_s1 + $0x24] sm:$0x3] %v189_v10  ;;  %v203_v12 = vld [vmem:[#allocation0 + $0xa0] sm:$0x3]  ;;  %v210_v13 = vld [vmem:[#allocation0 + $0xa8] sm:$0x3] }
  0x7f   :  { %340 = vst [vmem:[%s490_s1 + $0x26] sm:$0x3] %v196_v11  ;;  %341 = vst [vmem:[%s490_s1 + $0x28] sm:$0x3] %v203_v12  ;;  %v217_v14 = vld [vmem:[#allocation0 + $0xb0] sm:$0x3] }
  0x80   :  { %342 = vst [vmem:[%s490_s1 + $0x2a] sm:$0x3] %v210_v13  ;;  %v224_v15 = vld [vmem:[#allocation0 + $0xb8] sm:$0x3]  ;;  %v66_v16 = vld [vmem:[#allocation0] sm:$0x3] }
  0x81   :  { %343 = vst [vmem:[%s490_s1 + $0x2c] sm:$0x3] %v217_v14  ;;  %344 = vst [vmem:[%s490_s1 + $0x2e] sm:$0x3] %v224_v15  ;;  %v71_v17 = vld [vmem:[#allocation0 + $0x8] sm:$0x3] }
  0x82   :  { %69 = vst [vmem:[%s490_s1] sm:$0x3] %v66_v16  ;;  %v77_v18 = vld [vmem:[#allocation0 + $0x10] sm:$0x3]  ;;  %v84_v19 = vld [vmem:[#allocation0 + $0x18] sm:$0x3] }
  0x83   :  { %322 = vst [vmem:[%s490_s1 + $0x2] sm:$0x3] %v71_v17  ;;  %323 = vst [vmem:[%s490_s1 + $0x4] sm:$0x3] %v77_v18  ;;  %v91_v20 = vld [vmem:[#allocation0 + $0x20] sm:$0x3] }
  0x84   :  { %324 = vst [vmem:[%s490_s1 + $0x6] sm:$0x3] %v84_v19  ;;  %v98_v21 = vld [vmem:[#allocation0 + $0x28] sm:$0x3]  ;;  %v105_v22 = vld [vmem:[#allocation0 + $0x30] sm:$0x3] }
  0x85   :  { %325 = vst [vmem:[%s490_s1 + $0x8] sm:$0x3] %v91_v20  ;;  %326 = vst [vmem:[%s490_s1 + $0xa] sm:$0x3] %v98_v21  ;;  %v112_v23 = vld [vmem:[#allocation0 + $0x38] sm:$0x3] }
  0x86   :  { %327 = vst [vmem:[%s490_s1 + $0xc] sm:$0x3] %v105_v22  ;;  %v231_v24 = vld [vmem:[#allocation0 + $0xc0] sm:$0x3]  ;;  %v238_v25 = vld [vmem:[#allocation0 + $0xc8] sm:$0x3] }
  0x87   :  { %328 = vst [vmem:[%s490_s1 + $0xe] sm:$0x3] %v112_v23  ;;  %345 = vst [vmem:[%s490_s1 + $0x30] sm:$0x3] %v231_v24  ;;  %v245_v26 = vld [vmem:[#allocation0 + $0xd0] sm:$0x3] }
  0x88   :  { %346 = vst [vmem:[%s490_s1 + $0x32] sm:$0x3] %v238_v25  ;;  %v252_v27 = vld [vmem:[#allocation0 + $0xd8] sm:$0x3]  ;;  %v259_v28 = vld [vmem:[#allocation0 + $0xe0] sm:$0x3] }
  0x89   :  { %347 = vst [vmem:[%s490_s1 + $0x34] sm:$0x3] %v245_v26  ;;  %348 = vst [vmem:[%s490_s1 + $0x36] sm:$0x3] %v252_v27  ;;  %v266_v29 = vld [vmem:[#allocation0 + $0xe8] sm:$0x3] }
  0x8a   :  { %349 = vst [vmem:[%s490_s1 + $0x38] sm:$0x3] %v259_v28  ;;  %v273_v30 = vld [vmem:[#allocation0 + $0xf0] sm:$0x3]  ;;  %v280_v31 = vld [vmem:[#allocation0 + $0xf8] sm:$0x3] }
  0x8b   :  { %350 = vst [vmem:[%s490_s1 + $0x3a] sm:$0x3] %v266_v29  ;;  %351 = vst [vmem:[%s490_s1 + $0x3c] sm:$0x3] %v273_v30  ;;  %v119_v32 = vld [vmem:[#allocation0 + $0x40] sm:$0x3] }
  0x8c   :  { %352 = vst [vmem:[%s490_s1 + $0x3e] sm:$0x3] %v280_v31  ;;  %v126_v33 = vld [vmem:[#allocation0 + $0x48] sm:$0x3]  ;;  %v133_v34 = vld [vmem:[#allocation0 + $0x50] sm:$0x3] }
  0x8d   :  { %329 = vst [vmem:[%s490_s1 + $0x10] sm:$0x3] %v119_v32  ;;  %330 = vst [vmem:[%s490_s1 + $0x12] sm:$0x3] %v126_v33  ;;  %v140_v35 = vld [vmem:[#allocation0 + $0x58] sm:$0x3] }
  0x8e   :  { %331 = vst [vmem:[%s490_s1 + $0x14] sm:$0x3] %v133_v34  ;;  %v147_v36 = vld [vmem:[#allocation0 + $0x60] sm:$0x3]  ;;  %v154_v37 = vld [vmem:[#allocation0 + $0x68] sm:$0x3] }
  0x8f   :  { %332 = vst [vmem:[%s490_s1 + $0x16] sm:$0x3] %v140_v35  ;;  %333 = vst [vmem:[%s490_s1 + $0x18] sm:$0x3] %v147_v36  ;;  %v161_v38 = vld [vmem:[#allocation0 + $0x70] sm:$0x3] }
  0x90   :  { %334 = vst [vmem:[%s490_s1 + $0x1a] sm:$0x3] %v154_v37  ;;  %v168_v39 = vld [vmem:[#allocation0 + $0x78] sm:$0x3]  ;;  %335 = vst [vmem:[%s490_s1 + $0x1c] sm:$0x3] %v161_v38 }
  0x91   :  { %336 = vst [vmem:[%s490_s1 + $0x1e] sm:$0x3] %v168_v39 }

// kernel: acat_forward.2
= control target key start
LH: loop header
LB: loop body
LE: loop exit
PB: predicated region body
PF: predicated region fallthrough
CT: control target
= control target key end

     0   :  { %s1156_s15 = smov 0   ;;  %s1372_s0 = inlined_call_operand.vmem [shape: f32[2,2,24,32], index: 0, kind: input, shape index: {}]   ;;  %s1373_s1 = inlined_call_operand.vmem [shape: f32[2,288,64], index: 1, kind: input, shape index: {}]   ;;  %s1374_s2 = inlined_call_operand.vmem [shape: f32[2,1,32], index: 2, kind: input, shape index: {}]   ;;  %s1375_s3 = inlined_call_operand.vmem [shape: f32[2,64], index: 3, kind: input, shape index: {}]   ;;  %s1376_s4 = inlined_call_operand.vmem [shape: f32[2,32,64], index: 4, kind: output, shape index: {}]  }
   0x1 LB: > { %s913_s16 = sadd.s32 4294967295, %s1124_s15   ;;  %p917_p0 = scmp.ge.s32.totalorder %s1124_s15, 1  ;;  %s1124_s15 = sphi %s1156_s15, %s14_s15  }
   0x2   : > { %p180_p1 = scmp.lt.s32.totalorder %s1124_s15, 3 }
   0x4   : > { %p181_p2 = pnand %p917_p0, %p180_p1 }
   0x5   : > { %p214_p3 = scmp.lt.s32.totalorder (!%p181_p2), %s913_s16, 1  ;;  %s1126_s25 = smov (!%p181_p2), 32  }
   0x6   : > { %184 = sbr.rel (%p181_p2) target bundleno = 621 (0x26d), region = 36  ;;  %s1127_s26 = smov (!%p181_p2), 96  }
   0x7   : > { %s1128_s27 = smov (!%p181_p2), 64  }
   0xb   : > { %s1378_s16 = smov (!%p214_p3, %s913_s16), 1  ;;  %vm244_vm0 = vcmask 1046528   ;;  %vm328_vm1 = vcmask 1042432   ;;  %vm290_vm2 = vcmask 1044480   ;;  %vm374_vm3 = vcmask 1040384  }
   0xc   : > { %s1033_s17 = smul.u32 48, %s1378_s16  ;;  %vm267_vm4 = vcmask 1045504   ;;  %vm351_vm5 = vcmask 1041408   ;;  %vm397_vm6 = vcmask 261120   ;;  %vm313_vm7 = vcmask 1043456   ;;  %s226_s30 = scalar_lea.vmem %s1374_s2, %s1378_s16 }
   0xd   : > { %s1034_s18 = smul.u32 288, %s1378_s16  ;;  %vm402_vm8 = vcmask 523264   ;;  %vm407_vm9 = vcmask 785408   ;;  %vm1130_vm10 = vmmov 0   ;;  %s934_s7 = sshll.u32 %s1378_s16, 5 }
   0xe   : > { %s1171_s21 = scalar_lea.vmem %s1372_s0, %s1033_s17  ;;  %s231_s10 = scalar_lea.vmem %s1376_s4, %s934_s7 }
   0xf   : > { %s1176_s24 = scalar_lea.vmem %s1373_s1, %s1034_s18  ;;  %v1179_v0 = vld [vmem:[%s1171_s21] sm:$0xff]  ;;  %v1182_v1 = vld [vmem:[%s1171_s21 + $0x8] sm:$0xff]  ;;  %v1195_v10 = vld [vmem:[%s1171_s21 + $0x10] sm:$0xff] }
  0x10   : > { %v245_v2 = vrot.slane %v1179_v0, 1  ;;  %v246_v3 = vrot.slane %v1182_v1, 1  ;;  %v329_v4 = vrot.slane %v1179_v0, 5  ;;  %v330_v5 = vrot.slane %v1182_v1, 5  ;;  %1005 = vmatprep.mubr.msk.f32.mxu1 %vm397_vm6, %v1182_v1  ;;  %v455_v11 = vld [vmem:[%s1176_s24 + $0xf8] sm:$0xff]  ;;  %v454_v17 = vld [vmem:[%s1176_s24 + $0xf0] sm:$0xff] }
  0x11   : > { %v291_v6 = vrot.slane %v1179_v0, 3  ;;  %v292_v7 = vrot.slane %v1182_v1, 3  ;;  %v375_v8 = vrot.slane %v1179_v0, 7  ;;  %v376_v9 = vrot.slane %v1182_v1, 7  ;;  %935 = vmatprep.subr.mxu0 %v455_v11  ;;  %v439_v16 = vld [vmem:[%s1176_s24 + $0x78] sm:$0xff]  ;;  %v438_v18 = vld [vmem:[%s1176_s24 + $0x70] sm:$0xff] }
  0x12   : > { %v247_v12 = vsel %vm244_vm0, %v245_v2, %v246_v3  ;;  %v331_v13 = vsel %vm328_vm1, %v329_v4, %v330_v5  ;;  %v268_v14 = vrot.slane %v1179_v0, 2  ;;  %v269_v15 = vrot.slane %v1182_v1, 2  ;;  %v1209_v23 = vld [vmem:[%s1171_s21 + $0x18] sm:$0xff]  ;;  %936 = vmatpush3.msra.mxu0 %v439_v16  ;;  %v453_v24 = vld [vmem:[%s1176_s24 + $0xe8] sm:$0xff]  ;;  %v452_v34 = vld [vmem:[%s1176_s24 + $0xe0] sm:$0xff] }
  0x13   : > { %v1048_v19 = vpack.i.bf16 %v247_v12, %v331_v13  ;;  %v293_v20 = vsel %vm290_vm2, %v291_v6, %v292_v7  ;;  %v377_v21 = vsel %vm374_vm3, %v375_v8, %v376_v9  ;;  %v352_v22 = vrot.slane %v1179_v0, 6  ;;  %937 = vmatprep.subr.mxu0 %v454_v17  ;;  %v437_v29 = vld [vmem:[%s1176_s24 + $0x68] sm:$0xff]  ;;  %v1227_v38 = vld [vmem:[%s1171_s21 + $0x20] sm:$0xff]  ;;  %v451_v45 = vld [vmem:[%s1176_s24 + $0xd8] sm:$0xff] }
  0x14   : > { %v1058_v25 = vpack.i.bf16 %v293_v20, %v377_v21  ;;  %v270_v26 = vsel %vm267_vm4, %v268_v14, %v269_v15  ;;  %v353_v27 = vrot.slane %v1182_v1, 6  ;;  %v248_v28 = vrot.slane %v1195_v10, 1  ;;  %938 = vmatpush3.msra.mxu0 %v438_v18  ;;  %v436_v40 = vld [vmem:[%s1176_s24 + $0x60] sm:$0xff]  ;;  %v435_v50 = vld [vmem:[%s1176_s24 + $0x58] sm:$0xff]  ;;  %v450_v55 = vld [vmem:[%s1176_s24 + $0xd0] sm:$0xff] }
  0x15   : > { %1049 = vrot.lane.b32.xlu0 %v1048_v19, %s1126_s25  ;;  %v332_v30 = vrot.slane %v1195_v10, 5  ;;  %v271_v31 = vrot.slane %v1195_v10, 2  ;;  %v355_v32 = vrot.slane %v1195_v10, 6  ;;  %v294_v33 = vrot.slane %v1195_v10, 3  ;;  %939 = vmatprep.subr.mxu0 %v453_v24  ;;  %v1249_v60 = vld [vmem:[%s1171_s21 + $0x28] sm:$0xff]  ;;  %v434_v61 = vld [vmem:[%s1176_s24 + $0x50] sm:$0xff] }
  0x16   : > { %1059 = vrot.lane.b32.xlu1 %v1058_v25, %s1127_s26  ;;  %v354_v35 = vsel %vm351_vm5, %v352_v22, %v353_v27  ;;  %v249_v36 = vsel %vm244_vm0, %v246_v3, %v248_v28  ;;  %v378_v37 = vrot.slane %v1195_v10, 7  ;;  %v250_v39 = vrot.slane %v1209_v23, 1  ;;  %940 = vmatpush3.msra.mxu0 %v437_v29  ;;  %v449_v4 = vld [vmem:[%s1176_s24 + $0xc8] sm:$0xff]  ;;  %v432_v25 = vld [vmem:[%s1176_s24 + $0x40] sm:$0xff]  ;;  %v458_v28 = vld [vmem:[%s1176_s24 + $0x110] sm:$0xff] }
  0x17   : > { %v1053_v41 = vpack.i.bf16 %v270_v26, %v354_v35  ;;  %v333_v42 = vsel %vm328_vm1, %v330_v5, %v332_v30  ;;  %v272_v43 = vsel %vm267_vm4, %v269_v15, %v271_v31  ;;  %v356_v44 = vsel %vm351_vm5, %v353_v27, %v355_v32  ;;  %941 = vmatprep.subr.mxu0 %v452_v34  ;;  %v459_v5 = vld [vmem:[%s1176_s24 + $0x118] sm:$0xff]  ;;  %v448_v15 = vld [vmem:[%s1176_s24 + $0xc0] sm:$0xff]  ;;  %v446_v34 = vld [vmem:[%s1176_s24 + $0xb0] sm:$0xff] }
  0x18   : > { %v1063_v46 = vpack.i.bf16 %v249_v36, %v333_v42  ;;  %v1068_v47 = vpack.i.bf16 %v272_v43, %v356_v44  ;;  %v295_v48 = vsel %vm290_vm2, %v292_v7, %v294_v33  ;;  %v379_v49 = vsel %vm374_vm3, %v376_v9, %v378_v37  ;;  %942 = vmatpush3.msra.mxu0 %v436_v40  ;;  %v433_v9 = vld [vmem:[%s1176_s24 + $0x48] sm:$0xff]  ;;  %v447_v27 = vld [vmem:[%s1176_s24 + $0xb8] sm:$0xff]  ;;  %v430_v37 = vld [vmem:[%s1176_s24 + $0x30] sm:$0xff] }
  0x19   : > { %1054 = vrot.lane.b32.xlu0 %v1053_v41, %s1128_s27  ;;  %v1073_v51 = vpack.i.bf16 %v295_v48, %v379_v49  ;;  %v251_v52 = vrot.slane %v1227_v38, 1  ;;  %v334_v53 = vrot.slane %v1209_v23, 5  ;;  %v335_v54 = vrot.slane %v1227_v38, 5  ;;  %943 = vmatprep.subr.mxu0 %v451_v45  ;;  %v431_v30 = vld [vmem:[%s1176_s24 + $0x38] sm:$0xff]  ;;  %v457_v40 = vld [vmem:[%s1176_s24 + $0x108] sm:$0xff]  ;;  %v444_v44 = vld [vmem:[%s1176_s24 + $0xa0] sm:$0xff] }
  0x1a   : > { %1064 = vrot.lane.b32.xlu1 %v1063_v46, %s1126_s25  ;;  %v273_v56 = vrot.slane %v1209_v23, 2  ;;  %v274_v57 = vrot.slane %v1227_v38, 2  ;;  %v357_v58 = vrot.slane %v1209_v23, 6  ;;  %v358_v59 = vrot.slane %v1227_v38, 6  ;;  %944 = vmatpush3.msra.mxu0 %v435_v50  ;;  %v429_v42 = vld [vmem:[%s1176_s24 + $0x28] sm:$0xff]  ;;  %v428_v45 = vld [vmem:[%s1176_s24 + $0x20] sm:$0xff] }
  0x1b   : > { %v252_v62 = vsel %vm244_vm0, %v250_v39, %v251_v52  ;;  %v336_v63 = vsel %vm328_vm1, %v334_v53, %v335_v54  ;;  %v296_v2 = vrot.slane %v1209_v23, 3  ;;  %v297_v3 = vrot.slane %v1227_v38, 3  ;;  %945 = vmatprep.subr.mxu0 %v450_v55  ;;  %997 = vmatprep.subr.mxu1 %v459_v5  ;;  %v445_v39 = vld [vmem:[%s1176_s24 + $0xa8] sm:$0xff]  ;;  %v443_v46 = vld [vmem:[%s1176_s24 + $0x98] sm:$0xff]  ;;  %v442_v49 = vld [vmem:[%s1176_s24 + $0x90] sm:$0xff] }
  0x1c   : > { %v275_v6 = vsel %vm267_vm4, %v273_v56, %v274_v57  ;;  %v359_v7 = vsel %vm351_vm5, %v357_v58, %v358_v59  ;;  %v380_v8 = vrot.slane %v1209_v23, 7  ;;  %v1078_v11 = vpack.i.bf16 %v252_v62, %v336_v63  ;;  %946 = vmatpush3.msra.mxu0 %v434_v61  ;;  %998 = vmatpush3.msra.mxu1 %v459_v5  ;;  %v427_v48 = vld [vmem:[%s1176_s24 + $0x18] sm:$0xff]  ;;  %v426_v50 = vld [vmem:[%s1176_s24 + $0x10] sm:$0xff]  ;;  %v440_v53 = vld [vmem:[%s1176_s24 + $0x80] sm:$0xff] }
  0x1d   : > { %1069 = vrot.lane.b32.xlu0 %v1068_v47, %s1128_s27  ;;  %v1083_v12 = vpack.i.bf16 %v275_v6, %v359_v7  ;;  %v381_v13 = vrot.slane %v1227_v38, 7  ;;  %v253_v14 = vrot.slane %v1249_v60, 1  ;;  %v298_v16 = vsel %vm290_vm2, %v296_v2, %v297_v3  ;;  %947 = vmatprep.subr.mxu0 %v449_v4  ;;  %v456_v47 = vld [vmem:[%s1176_s24 + $0x100] sm:$0xff] }
  0x1e   : > { %1074 = vrot.lane.b32.xlu1 %v1073_v51, %s1127_s26  ;;  %v337_v17 = vrot.slane %v1249_v60, 5  ;;  %v276_v18 = vrot.slane %v1249_v60, 2  ;;  %v360_v19 = vrot.slane %v1249_v60, 6  ;;  %v299_v22 = vrot.slane %v1249_v60, 3  ;;  %948 = vmatpush3.msra.mxu0 %v433_v9  ;;  %v441_v51 = vld [vmem:[%s1176_s24 + $0x88] sm:$0xff] }
  0x1f   : > { %v382_v20 = vsel %vm374_vm3, %v380_v8, %v381_v13  ;;  %v254_v21 = vsel %vm244_vm0, %v251_v52, %v253_v14  ;;  %v383_v24 = vrot.slane %v1249_v60, 7  ;;  %949 = vmatprep.subr.mxu0 %v448_v15  ;;  %999 = vmatprep.subr.mxu1 %v458_v28  ;;  %v425_v52 = vld [vmem:[%s1176_s24 + $0x8] sm:$0xff]  ;;  %v314_v55 = vrot.slane %v1179_v0, 4 }
  0x20   : > { %v338_v26 = vsel %vm328_vm1, %v335_v54, %v337_v17  ;;  %v1088_v29 = vpack.i.bf16 %v298_v16, %v382_v20  ;;  %v277_v32 = vsel %vm267_vm4, %v274_v57, %v276_v18  ;;  %v361_v33 = vsel %vm351_vm5, %v358_v59, %v360_v19  ;;  %950 = vmatpush3.msra.mxu0 %v432_v25  ;;  %v424_v54 = vld [vmem:[%s1176_s24] sm:$0xff] }
  0x21   : > { %1079 = vrot.lane.b32.xlu0 %v1078_v11, %s1126_s25  ;;  %v1093_v31 = vpack.i.bf16 %v254_v21, %v338_v26  ;;  %v300_v35 = vsel %vm290_vm2, %v297_v3, %v299_v22  ;;  %v384_v36 = vsel %vm374_vm3, %v381_v13, %v383_v24  ;;  %951 = vmatprep.subr.mxu0 %v447_v27  ;;  %v315_v56 = vrot.slane %v1182_v1, 4 }
  0x22   : > { %1084 = vrot.lane.b32.xlu1 %v1083_v12, %s1128_s27  ;;  %952 = vmatpush3.msra.mxu0 %v431_v30  ;;  %v1098_v41 = vpack.i.bf16 %v277_v32, %v361_v33  ;;  %v1103_v43 = vpack.i.bf16 %v300_v35, %v384_v36  ;;  %v317_v63 = vrot.slane %v1195_v10, 4  ;;  %v319_v18 = vrot.slane %v1209_v23, 4 }
  0x23   : > { %1000 = vmatpush3.msra.mxu1 %v458_v28  ;;  %953 = vmatprep.subr.mxu0 %v446_v34  ;;  %v316_v62 = vsel %vm313_vm7, %v314_v55, %v315_v56  ;;  %v320_v19 = vrot.slane %v1227_v38, 4 }
  0x24   : > { %954 = vmatpush3.msra.mxu0 %v430_v37  ;;  %1001 = vmatprep.subr.mxu1 %v457_v40 }
  0x25   : > { %1089 = vrot.lane.b32.xlu0 %v1088_v29, %s1127_s26  ;;  %955 = vmatprep.subr.mxu0 %v445_v39  ;;  %v321_v32 = vsel %vm313_vm7, %v319_v18, %v320_v19 }
  0x26   : > { %1094 = vrot.lane.b32.xlu1 %v1093_v31, %s1126_s25  ;;  %956 = vmatpush3.msra.mxu0 %v429_v42 }
  0x27   : > { %1002 = vmatpush3.msra.mxu1 %v457_v40  ;;  %957 = vmatprep.subr.mxu0 %v444_v44  ;;  %v322_v40 = vrot.slane %v1249_v60, 4 }
  0x28   : > { %958 = vmatpush3.msra.mxu0 %v428_v45  ;;  %1003 = vmatprep.subr.mxu1 %v456_v47 }
  0x29   : > { %1099 = vrot.lane.b32.xlu0 %v1098_v41, %s1128_s27  ;;  %959 = vmatprep.subr.mxu0 %v443_v46 }
  0x2a   : > { %1104 = vrot.lane.b32.xlu1 %v1103_v43, %s1127_s26  ;;  %960 = vmatpush3.msra.mxu0 %v427_v48 }
  0x2b   : > { %1004 = vmatpush3.msra.mxu1 %v456_v47  ;;  %961 = vmatprep.subr.mxu0 %v442_v49 }
  0x2c   : > { %1006 = vmatmul.mubr.msk.f32.vlgmr.msra.gmra.mxu1 %vm397_vm6, %v1195_v10  ;;  %962 = vmatpush3.msra.mxu0 %v426_v50  ;;  %v318_v10 = vsel %vm313_vm7, %v315_v56, %v317_v63  ;;  %v1129_v63 = vmov 0.0  }
  0x2d   : > { %1008 = vmatprep.mubr.msk.f32.mxu1 %vm397_vm6, %v1227_v38  ;;  %963 = vmatprep.subr.mxu0 %v441_v51  ;;  %v323_v51 = vsel %vm313_vm7, %v320_v19, %v322_v40 }
  0x2e   : > { %964 = vmatpush3.msra.mxu0 %v425_v52  ;;  %1011 = vmatprep.subr.mxu1 %v1129_v63 }
  0x2f   : > { %965 = vmatprep.subr.mxu0 %v440_v53 }
  0x30   : > { %1009 = vmatmul.mubr.msk.f32.gmra.mxu1 %vm397_vm6, %v1249_v60  ;;  %966 = vmatpush3.msra.mxu0 %v424_v54 }
  0x31   : > { %1019 = vmatprep.mubr.msk.f32.mxu1 %vm1130_vm10, %v1129_v63 }
  0x87   : > { %v1050_v57 = vpop.permute.xlu0 %1049 }
  0x88   : > { %v1060_v58 = vpop.permute.xlu1 %1059  ;;  %v1052_v59 = vunpack.i.h.bf16 %v1050_v57  ;;  %v1051_v61 = vunpack.i.l.bf16 %v1050_v57 }
  0x89   : > { %v1062_v3 = vunpack.i.h.bf16 %v1060_v58  ;;  %v1061_v4 = vunpack.i.l.bf16 %v1060_v58 }
  0x8a   : > { %v412_v11 = vsel %vm397_vm6, %v316_v62, %v1051_v61  ;;  %v398_v12 = vsel %vm397_vm6, %v1179_v0, %v1052_v59 }
  0x8b   : > { %v1055_v2 = vpop.permute.xlu0 %1054 }
  0x8c   : > { %v1057_v5 = vunpack.i.h.bf16 %v1055_v2  ;;  %v1056_v6 = vunpack.i.l.bf16 %v1055_v2  ;;  %v1065_v7 = vpop.permute.xlu1 %1064 }
  0x8d   : > { %v1067_v8 = vunpack.i.h.bf16 %v1065_v7  ;;  %v1066_v9 = vunpack.i.l.bf16 %v1065_v7 }
  0x8e   : > { %v416_v13 = vsel %vm402_vm8, %v412_v11, %v1056_v6  ;;  %v403_v14 = vsel %vm402_vm8, %v398_v12, %v1057_v5 }
  0x8f   : > { %v1070_v15 = vpop.permute.xlu0 %1069  ;;  %v420_v16 = vsel %vm407_vm9, %v416_v13, %v1061_v4  ;;  %v408_v17 = vsel %vm407_vm9, %v403_v14, %v1062_v3  ;;  %v413_v25 = vsel %vm397_vm6, %v318_v10, %v1066_v9  ;;  %v399_v26 = vsel %vm397_vm6, %v1182_v1, %v1067_v8 }
  0x90   : > { %v1072_v20 = vunpack.i.h.bf16 %v1070_v15  ;;  %v1071_v21 = vunpack.i.l.bf16 %v1070_v15  ;;  %v1075_v22 = vpop.permute.xlu1 %1074  ;;  %532 = vmatprep.mubr.f32.mxu0 %v420_v16 }
  0x91   : > { %v1077_v0 = vunpack.i.h.bf16 %v1075_v22  ;;  %v1076_v24 = vunpack.i.l.bf16 %v1075_v22  ;;  %533 = vmatmul.mubr.f32.vlgmr.msra.gmra.mxu0 %v408_v17 }
  0x92   : > { %v417_v27 = vsel %vm402_vm8, %v413_v25, %v1071_v21  ;;  %v404_v28 = vsel %vm402_vm8, %v399_v26, %v1072_v20  ;;  %v638_v21 = vld [vmem:[%s226_s30] sm:$0x1] }
  0x93   : > { %v1080_v29 = vpop.permute.xlu0 %1079  ;;  %v421_v30 = vsel %vm407_vm9, %v417_v27, %v1076_v24  ;;  %v409_v31 = vsel %vm407_vm9, %v404_v28, %v1077_v0 }
  0x94   : > { %v1082_v33 = vunpack.i.h.bf16 %v1080_v29  ;;  %v1081_v34 = vunpack.i.l.bf16 %v1080_v29  ;;  %v1085_v35 = vpop.permute.xlu1 %1084  ;;  %537 = vmatprep.mubr.f32.mxu0 %v421_v30 }
  0x95   : > { %v1087_v36 = vunpack.i.h.bf16 %v1085_v35  ;;  %v1086_v37 = vunpack.i.l.bf16 %v1085_v35  ;;  %538 = vmatmul.mubr.f32.gmra.mxu0 %v409_v31  ;;  %v790_v35 = vld [vmem:[%s1375_s3] sm:$0x3] }
  0x96   : > { %v414_v1 = vsel %vm397_vm6, %v321_v32, %v1081_v34  ;;  %v400_v39 = vsel %vm397_vm6, %v1209_v23, %v1082_v33  ;;  %v797_v33 = vlaneseq }
  0x97   : > { %v1090_v41 = vpop.permute.xlu0 %1089  ;;  %v418_v47 = vsel %vm402_vm8, %v414_v1, %v1086_v37  ;;  %v405_v48 = vsel %vm402_vm8, %v400_v39, %v1087_v36 }
  0x98   : > { %v1092_v42 = vunpack.i.h.bf16 %v1090_v41  ;;  %v1091_v43 = vunpack.i.l.bf16 %v1090_v41  ;;  %v1095_v44 = vpop.permute.xlu1 %1094  ;;  %v798_v34 = vshrl.u32 %v797_v33, 7 }
  0x99   : > { %v1097_v45 = vunpack.i.h.bf16 %v1095_v44  ;;  %v1096_v46 = vunpack.i.l.bf16 %v1095_v44 }
  0x9a   : > { %v422_v49 = vsel %vm407_vm9, %v418_v47, %v1091_v43  ;;  %v410_v50 = vsel %vm407_vm9, %v405_v48, %v1092_v42  ;;  %v799_v37 = vsub.s32 0, %v798_v34  ;;  %v807_v42 = vsub.s32 1, %v798_v34 }
  0x9b   : > { %v1100_v52 = vpop.permute.xlu0 %1099  ;;  %542 = vmatprep.mubr.f32.mxu0 %v422_v49  ;;  %v415_v56 = vsel %vm397_vm6, %v323_v51, %v1096_v46  ;;  %v401_v57 = vsel %vm397_vm6, %v1227_v38, %v1097_v45 }
  0x9c   : > { %v1102_v23 = vunpack.i.h.bf16 %v1100_v52  ;;  %v1101_v60 = vunpack.i.l.bf16 %v1100_v52  ;;  %v1105_v53 = vpop.permute.xlu1 %1104  ;;  %543 = vmatmul.mubr.f32.gmra.mxu0 %v410_v50 }
  0x9d   : > { %v1107_v54 = vunpack.i.h.bf16 %v1105_v53  ;;  %v1106_v55 = vunpack.i.l.bf16 %v1105_v53 }
  0x9e   : > { %v419_v58 = vsel %vm402_vm8, %v415_v56, %v1101_v60  ;;  %v406_v59 = vsel %vm402_vm8, %v401_v57, %v1102_v23 }
  0x9f   : > { %v423_v61 = vsel %vm407_vm9, %v419_v58, %v1106_v55  ;;  %v411_v62 = vsel %vm407_vm9, %v406_v59, %v1107_v54 }
  0xa0   : > { %547 = vmatprep.mubr.f32.mxu0 %v423_v61 }
  0xa1   : > { %548 = vmatmul.mubr.f32.gmra.mxu0 %v411_v62 }
  0xec   : > { %v1007_v38 = vpop.f32.mrf.mxu1 }
  0xee   : > { %v619_v8 = vpop.f32.mrf.mxu1 }
  0xf0   : > { %v1010_v9 = vpop.f32.mrf.mxu1 }
  0xf2   : > { %v629_v10 = vpop.f32.mrf.mxu1 }
 0x151   : > { %v967_v2 = vpop.f32.mrf.mxu0 }
 0x153   : > { %v968_v3 = vpop.f32.mrf.mxu0 }
 0x154   : > { %v969_v17 = vadd.f32 %v968_v3, %v967_v2 }
 0x155   : > { %v970_v4 = vpop.f32.mrf.mxu0 }
 0x156   : > { %v620_v20 = vadd.f32 %v969_v17, %v619_v8 }
 0x157   : > { %v971_v5 = vpop.f32.mrf.mxu0 }
 0x158   : > { %v972_v15 = vadd.f32 %v971_v5, %v970_v4  ;;  %v712_v25 = vmul.f32 %v620_v20, %v620_v20 }
 0x15a   : > { %v625_v19 = vadd.f32 %v1007_v38, %v972_v15 }
 0x15c   : > { %v973_v6 = vpop.f32.mrf.mxu0  ;;  %v713_v24 = vmul.f32 %v625_v19, %v625_v19 }
 0x15e   : > { %v974_v7 = vpop.f32.mrf.mxu0 }
 0x15f   : > { %v975_v13 = vadd.f32 %v974_v7, %v973_v6 }
 0x161   : > { %v976_v11 = vpop.f32.mrf.mxu0  ;;  %v630_v18 = vadd.f32 %v975_v13, %v629_v10 }
 0x163   : > { %v977_v12 = vpop.f32.mrf.mxu0  ;;  %v714_v0 = vmul.f32 %v630_v18, %v630_v18 }
 0x164   : > { %v978_v14 = vadd.f32 %v977_v12, %v976_v11 }
 0x166   : > { %v635_v16 = vadd.f32 %v1010_v9, %v978_v14 }
 0x168   : > { %1012 = vmatpush3.msra.mxu1 %v635_v16  ;;  %v715_v22 = vmul.f32 %v635_v16, %v635_v16 }
 0x169   : > { %1013 = vmatprep.subr.mxu1 %v1129_v63 }
 0x16a   : > { %1014 = vmatpush3.msra.mxu1 %v630_v18 }
 0x16b   : > { %1015 = vmatprep.subr.mxu1 %v1129_v63 }
 0x16c   : > { %1016 = vmatpush3.msra.mxu1 %v625_v19 }
 0x16d   : > { %1017 = vmatprep.subr.mxu1 %v1129_v63 }
 0x16e   : > { %1018 = vmatpush3.msra.mxu1 %v620_v20 }
 0x16f   : > { %1020 = vmatmul.mubr.msk.f32.vlgmr.msra.gmra.mxu1 %vm397_vm6, %v638_v21  ;;  %1022 = vmatprep.subr.mxu1 %v1129_v63 }
 0x170   : > { %1023 = vmatpush3.msra.mxu1 %v715_v22  ;;  %1030 = vmatprep.mubr.msk.f32.mxu1 %vm1130_vm10, %v1129_v63 }
 0x171   : > { %1024 = vmatprep.subr.mxu1 %v1129_v63 }
 0x172   : > { %1025 = vmatpush3.msra.mxu1 %v714_v0 }
 0x173   : > { %1026 = vmatprep.subr.mxu1 %v1129_v63 }
 0x174   : > { %1027 = vmatpush3.msra.mxu1 %v713_v24 }
 0x175   : > { %1028 = vmatprep.subr.mxu1 %v1129_v63 }
 0x176   : > { %1029 = vmatpush3.msra.mxu1 %v712_v25 }
 0x177   : > { %1031 = vmatmul.mubr.msk.f32.vlgmr.msra.gmra.mxu1 %vm397_vm6, %v638_v21 }
 0x22f   : > { %v708_v26 = vpop.f32.mrf.mxu1 }
 0x230   : > { %v786_v28 = vmul.f32 %v708_v26, %v708_v26 }
 0x231   : > { %v1021_v27 = vpop.f32.mrf.mxu1 }
 0x237   : > { %v782_v29 = vpop.f32.mrf.mxu1 }
 0x238   : > { %v787_v30 = vsub.f32 %v782_v29, %v786_v28 }
 0x239   : > { %v1032_v31 = vpop.f32.mrf.mxu1 }
 0x23a   : > { %v788_v32 = vadd.f32 1e-05, %v787_v30 }
 0x23c   : > { %1108 = vrsqrt.f32 %v788_v32 }
 0x249   : > { %v1109_v36 = vpop.eup %1108 }
 0x24a   : > { %v791_v1 = vmul.f32 %v1109_v36, %v790_v35 }
 0x24c   : > { %v792_v39 = vmul.f32 %v791_v1, %v708_v26  ;;  %v800_v40 = vrot.slane %v791_v1, %v799_v37 }
 0x24e   : > { %v794_v41 = vrot.slane %v792_v39, 7  ;;  %v801_v44 = vmul.f32 %v800_v40, %v620_v20  ;;  %v802_v45 = vmul.f32 %v800_v40, %v625_v19  ;;  %v803_v46 = vmul.f32 %v800_v40, %v630_v18 }
 0x24f   : > { %v804_v47 = vmul.f32 %v800_v40, %v635_v16 }
 0x250   : > { %v796_v43 = vsub.f32 %v790_v35, %v794_v41 }
 0x252   : > { %v808_v48 = vrot.slane %v796_v43, %v807_v42 }
 0x254   : > { %v809_v49 = vadd.f32 %v808_v48, %v801_v44  ;;  %v810_v50 = vadd.f32 %v808_v48, %v802_v45  ;;  %v811_v51 = vadd.f32 %v808_v48, %v803_v46  ;;  %v812_v52 = vadd.f32 %v808_v48, %v804_v47 }
 0x256   : > { %v817_v23 = vmul.f32 1.442695, %v809_v49  ;;  %v819_v60 = vmul.f32 1.442695, %v810_v50  ;;  %v821_v53 = vmul.f32 1.442695, %v811_v51 }
 0x257   : > { %v823_v54 = vmul.f32 1.442695, %v812_v52  ;;  %vm813_vm11 = vcmp.gt.f32.partialorder %v809_v49, 0.0  ;;  %vm814_vm12 = vcmp.gt.f32.partialorder %v810_v50, 0.0  ;;  %vm815_vm13 = vcmp.gt.f32.partialorder %v811_v51, 0.0 }
 0x258   : > { %1110 = vpow2.f32 %v817_v23  ;;  %vm816_vm14 = vcmp.gt.f32.partialorder %v812_v52, 0.0 }
 0x259   : > { %1112 = vpow2.f32 %v819_v60 }
 0x25a   : > { %1114 = vpow2.f32 %v821_v53 }
 0x25b   : > { %1116 = vpow2.f32 %v823_v54 }
 0x265   : > { %v1111_v55 = vpop.eup %1110 }
 0x266   : > { %v1113_v56 = vpop.eup %1112  ;;  %v928_v57 = vadd.f32 -1.0, %v1111_v55 }
 0x267   : > { %v1115_v58 = vpop.eup %1114  ;;  %v929_v59 = vadd.f32 -1.0, %v1113_v56 }
 0x268   : > { %v1117_v61 = vpop.eup %1116  ;;  %v930_v62 = vadd.f32 -1.0, %v1115_v58  ;;  %v829_v63 = vsel %vm813_vm11, %v809_v49, %v928_v57 }
 0x269   : > { %v931_v2 = vadd.f32 -1.0, %v1117_v61  ;;  %v830_v3 = vsel %vm814_vm12, %v810_v50, %v929_v59  ;;  %833 = vst.msk [vmem:[%s231_s10] sm:$0xff] %vm402_vm8, %v829_v63 }
 0x26a   : > { %v831_v4 = vsel %vm815_vm13, %v811_v51, %v930_v62  ;;  %834 = vst.msk [vmem:[%s231_s10 + $0x8] sm:$0xff] %vm402_vm8, %v830_v3 }
 0x26b   : > { %v832_v5 = vsel %vm816_vm14, %v812_v52, %v931_v2  ;;  %835 = vst.msk [vmem:[%s231_s10 + $0x10] sm:$0xff] %vm402_vm8, %v831_v4 }
 0x26c   : > { %836 = vst.msk [vmem:[%s231_s10 + $0x18] sm:$0xff] %vm402_vm8, %v832_v5 }
 0x26d PF: > { %s14_s15 = sadd.s32 1, %s1124_s15  }
 0x26e   : > { %p11_p4 = scmp.ge.s32.totalorder %s14_s15, 4  }
 0x270   :  { %13 = sbr.rel (!%p11_p4) target bundleno = 1 (0x1), region = 72 }

// kernel: acat_forward.3
= control target key start
LH: loop header
LB: loop body
LE: loop exit
PB: predicated region body
PF: predicated region fallthrough
CT: control target
= control target key end

     0   :  { %10 = vsyncpa [#allocation3], 0  ;;  %s1830_s0 = inlined_call_operand.vmem [shape: f32[4,2,16,16], index: 0, kind: input, shape index: {}]   ;;  %s1831_s1 = inlined_call_operand.vmem [shape: f32[4,2,16,16], index: 1, kind: input, shape index: {}]   ;;  %s1832_s2 = inlined_call_operand.vmem [shape: f32[4,16,16], index: 2, kind: input, shape index: {}]   ;;  %s1833_s3 = inlined_call_operand.hbm [shape: f32[64,16], index: 3, kind: output, shape index: {0}]   ;;  %s1834_s4 = inlined_call_operand.hbm [shape: f32[64,16], index: 4, kind: output, shape index: {1}]  }
   0x1   :  { %12 = vsyncpa [#allocation3 + $0x1], 0 }
   0x2   :  { %13 = vsyncpa [#allocation5], 0 }
   0x3   :  { %15 = vsyncpa [#allocation5 + $0x1], 0  ;;  %s1590_s15 = smov 0   ;;  %s1592_s16 = smov 0  }
   0x4   :  { %s1594_s17 = smov 0   ;;  %s1596_s18 = smov 0  }
   0x5 LB: > { %s1611_s19 = sadd.s32 4294967295, %s1558_s18   ;;  %s1248_s20 = sadd.s32 4294967294, %s1558_s18   ;;  %s1558_s18 = sphi %s1596_s18, %s1840_s18   ;;  %s1554_s17 = sphi %s1594_s17, %s1839_s17   ;;  %s1550_s16 = sphi %s1592_s16, %s1838_s16   ;;  %s1546_s15 = sphi %s1590_s15, %s1837_s15  }
   0x6   : > { %s1615_s21 = sadd.s32 1, %s1558_s18   ;;  %s106_s22 = sadd.s32 1, %s1554_s17 }
   0x7   : > { %s103_s23 = ssub.s32 %s1558_s18, %s1615_s21  ;;  %p116_p0 = scmp.ne.s32.totalorder %s1554_s17, %s1550_s16 }
   0x8   : > { %p104_p1 = scmp.eq.s32.totalorder %s103_s23, 0  ;;  %p117_p2 = scmp.eq.s32.totalorder %s1611_s19, 1 }
   0x9   : > { %p122_p3 = scmp.ne.s32.totalorder %s1550_s16, %s1546_s15  ;;  %p123_p4 = scmp.eq.s32.totalorder %s1248_s20, 1 }
   0xa   : > { %s1626_s24 = scalar_select %p104_p1, %s1554_s17, %s106_s22  }
   0xb   : > { %p1628_p5 = por %p117_p2, %p116_p0  ;;  %p1632_p6 = por %p123_p4, %p122_p3 }
   0xc   : > { %p1251_p7 = scmp.ge.s32.totalorder %s1558_s18, 1  ;;  %p197_p8 = scmp.lt.s32.totalorder %s1558_s18, 3 }
   0xe   : > { %p198_p9 = pnand %p1251_p7, %p197_p8 }
   0xf   : > { %s1254_s27 = sshll.u32 (!%p198_p9), %s1611_s19, 1  ;;  %s1724_s13 = sand.u32 (!%p198_p9), 1, %s1550_s16  }
  0x10   : > { %201 = sbr.rel (%p198_p9) target bundleno = 1123 (0x463), region = 32  ;;  %p242_p10 = scmp.lt.s32.totalorder (!%p198_p9), %s1254_s27, 3 }
  0x11   : > { %s1252_s14 = sshll.u32 (!%p198_p9), %s1724_s13, 5  ;;  %s1296_s23 = sshll.u32 (!%p198_p9), %s1611_s19, 9 }
  0x12   : > { %s240_s20 = scalar_lea.vmem (!%p198_p9), [#allocation4], %s1252_s14  ;;  %s1744_s29 = scalar_lea.hbm (!%p198_p9), %s1834_s4, %s1296_s23 }
  0x13   : > { %s1130_s22 = sshll.u32 (!%p198_p9), %s240_s20, 4  ;;  %s1101_s30 = scalar_lea.sflag (!%p198_p9), [#allocation5], %s1724_s13  ;;  %s1746_s22 = int_to_ptr.vmem [resolvable:$true] %s1130_s22 }
  0x14   : > { %s1561_s6 = smov (!%p198_p9), [#allocation4]  }
  0x15   : > { %s1842_s27 = smov (!%p242_p10, %s1254_s27), 3  ;;  %vm280_vm0 = vcmask 1040384   ;;  %vm285_vm1 = vcmask 130048   ;;  %vm630_vm2 = vcmask 15360   ;;  %vm804_vm4 = vcmask 1041408   ;;  %s1472_s7 = sshll.u32 %s1561_s6, 4  ;;  %s1473_s7 = int_to_ptr.vmem [resolvable:$false] %s1472_s7 }
  0x16   : > { %s1293_s28 = sshll.u32 %s1842_s27, 5  ;;  %vm739_vm5 = vcmask 123904   ;;  %s1295_s9 = sshll.u32 %s1842_s27, 4 }
  0x17   : > { %s253_s5 = scalar_lea.vmem %s1831_s1, %s1293_s28  ;;  %s1648_s8 = scalar_lea.vmem %s1830_s0, %s1293_s28 }
  0x18   : > { %v272_v0 = vld [vmem:[%s253_s5] sm:$0xff]  ;;  %v273_v1 = vld [vmem:[%s253_s5 + $0x8] sm:$0xff]  ;;  %v274_v2 = vld [vmem:[%s253_s5 + $0x10] sm:$0xff]  ;;  %s1718_s12 = scalar_lea.vmem %s1832_s2, %s1295_s9  ;;  %p1475_p0 = scmp.lt.s32.totalorder %s1746_s22, %s1473_s7 }
  0x19   : > { %v281_v3 = vsel %vm280_vm0, %v272_v0, %v273_v1  ;;  %v275_v4 = vld [vmem:[%s253_s5 + $0x18] sm:$0xff]  ;;  %v264_v5 = vld [vmem:[%s1648_s8] sm:$0xff]  ;;  %v265_v7 = vld [vmem:[%s1648_s8 + $0x8] sm:$0xff] }
  0x1a   : > { %1323 = vmatprep.subr.msk.mxu0 %vm285_vm1, %v281_v3  ;;  %v282_v6 = vsel %vm280_vm0, %v274_v2, %v275_v4  ;;  %1325 = vmatprep.mubr.msk.f32.mxu0 %vm285_vm1, %v264_v5  ;;  %v266_v8 = vld [vmem:[%s1648_s8 + $0x10] sm:$0xff]  ;;  %v279_v10 = vld [vmem:[%s253_s5 + $0x38] sm:$0xff]  ;;  %v276_v11 = vld [vmem:[%s253_s5 + $0x20] sm:$0xff] }
  0x1b   : > { %v278_v9 = vld [vmem:[%s253_s5 + $0x30] sm:$0xff]  ;;  %1324 = vmatpush3.xpose.msk.msra.mxu0 %vm285_vm1, %v281_v3  ;;  %1328 = vmatprep.subr.msk.mxu1 %vm285_vm1, %v282_v6  ;;  %v277_v12 = vld [vmem:[%s253_s5 + $0x28] sm:$0xff]  ;;  %v267_v13 = vld [vmem:[%s1648_s8 + $0x18] sm:$0xff]  ;;  %s1468_s5 = scalar_lea.vmem %s1746_s22, 512 }
  0x1c   : > { %1329 = vmatpush3.xpose.msk.msra.mxu1 %vm285_vm1, %v282_v6  ;;  %1330 = vmatprep.mubr.msk.f32.mxu1 %vm285_vm1, %v266_v8  ;;  %v284_v14 = vsel %vm280_vm0, %v278_v9, %v279_v10  ;;  %v283_v15 = vsel %vm280_vm0, %v276_v11, %v277_v12  ;;  %v270_v16 = vld [vmem:[%s1648_s8 + $0x30] sm:$0xff]  ;;  %v268_v17 = vld [vmem:[%s1648_s8 + $0x20] sm:$0xff]  ;;  %v269_v18 = vld [vmem:[%s1648_s8 + $0x28] sm:$0xff]  ;;  %p1469_p11 = scmp.ne.s32.totalorder %s1746_s22, %s1468_s5 }
  0x1d   : > { %1338 = vmatprep.subr.msk.mxu1 %vm285_vm1, %v284_v14  ;;  %1333 = vmatprep.subr.msk.mxu0 %vm285_vm1, %v283_v15  ;;  %v271_v19 = vld [vmem:[%s1648_s8 + $0x38] sm:$0xff]  ;;  %s1474_s8 = scalar_lea.vmem %s1473_s7, 1024 }
  0x1e   : > { %1326 = vmatmul.mubr.msk.f32.vlgmr.msra.gmra.mxu0 %vm285_vm1, %v265_v7  ;;  %p1470_p12 = pnand %p1469_p11, %p1628_p5  ;;  %p1476_p1 = scmp.lt.s32.totalorder %s1474_s8, %s1468_s5 }
  0x1f   : > { %1331 = vmatmul.mubr.msk.f32.vlgmr.msra.gmra.mxu1 %vm285_vm1, %v267_v13  ;;  %1334 = vmatpush3.xpose.msk.msra.mxu0 %vm285_vm1, %v283_v15 }
  0x20   : > { %1339 = vmatpush3.xpose.msk.msra.mxu1 %vm285_vm1, %v284_v14  ;;  %1340 = vmatprep.mubr.msk.f32.mxu1 %vm285_vm1, %v270_v16  ;;  %p1471_p13 = pneg %p1470_p12  ;;  %p1477_p2 = por %p1476_p1, %p1475_p0 }
  0x21   : > { %1335 = vmatprep.mubr.msk.f32.mxu0 %vm285_vm1, %v268_v17 }
  0x22   : > { %1336 = vmatmul.mubr.msk.f32.vlgmr.msra.gmra.mxu0 %vm285_vm1, %v269_v18  ;;  %p1478_p3 = pnand %p1477_p2, %p1471_p13 }
  0x23   : > { %1341 = vmatmul.mubr.msk.f32.vlgmr.msra.gmra.mxu1 %vm285_vm1, %v271_v19 }
  0xde   : > { %v1327_v20 = vpop.f32.mrf.mxu0 }
  0xdf   : > { %v623_v21 = vmul.f32 0.25, %v1327_v20  ;;  %v1332_v22 = vpop.f32.mrf.mxu1 }
  0xe0   : > { %v361_v23 = vpop.f32.mrf.mxu0  ;;  %v625_v24 = vmul.f32 0.25, %v1332_v22 }
  0xe1   : > { %v622_v25 = vmul.f32 0.25, %v361_v23  ;;  %v445_v26 = vpop.f32.mrf.mxu1  ;;  %v634_v27 = vsel %vm630_vm2, %v623_v21, -inf }
  0xe2   : > { %635 = vmax.xlane.f32.xlu1 %v634_v27  ;;  %v1337_v28 = vpop.f32.mrf.mxu0  ;;  %v624_v29 = vmul.f32 0.25, %v445_v26  ;;  %v640_v32 = vsel %vm630_vm2, %v625_v24, -inf }
  0xe3   : > { %v1342_v30 = vpop.f32.mrf.mxu1  ;;  %v631_v31 = vsel %vm630_vm2, %v622_v25, -inf  ;;  %v627_v41 = vmul.f32 0.25, %v1337_v28 }
  0xe4   : > { %632 = vmax.xlane.f32.xlu0 %v631_v31  ;;  %v529_v33 = vpop.f32.mrf.mxu0  ;;  %v637_v37 = vsel %vm630_vm2, %v624_v29, -inf  ;;  %v629_v39 = vmul.f32 0.25, %v1342_v30 }
  0xe5   : > { %v613_v34 = vpop.f32.mrf.mxu1  ;;  %v626_v35 = vmul.f32 0.25, %v529_v33  ;;  %v646_v43 = vsel %vm630_vm2, %v627_v41, -inf }
  0xe6   : > { %v628_v36 = vmul.f32 0.25, %v613_v34  ;;  %641 = vmax.xlane.f32.xlu1 %v640_v32  ;;  %v652_v42 = vsel %vm630_vm2, %v629_v39, -inf }
  0xe7   : > { %v643_v40 = vsel %vm630_vm2, %v626_v35, -inf }
  0xe8   : > { %638 = vmax.xlane.f32.xlu0 %v637_v37  ;;  %v649_v38 = vsel %vm630_vm2, %v628_v36, -inf }
  0xea   : > { %650 = vmax.xlane.f32.xlu1 %v649_v38 }
  0xec   : > { %644 = vmax.xlane.f32.xlu0 %v643_v40 }
  0xee   : > { %653 = vmax.xlane.f32.xlu1 %v652_v42 }
  0xf0   : > { %647 = vmax.xlane.f32.xlu0 %v646_v43 }
 0x16b   : > { %v636_v44 = vpop.xlane.xlu1 %635 }
 0x16c   : > { %v656_v45 = vsub.f32 %v623_v21, %v636_v44 }
 0x16d   : > { %v633_v46 = vpop.xlane.xlu0 %632 }
 0x16e   : > { %v665_v47 = vmul.f32 1.442695, %v656_v45  ;;  %v655_v48 = vsub.f32 %v622_v25, %v633_v46 }
 0x16f   : > { %v642_v49 = vpop.xlane.xlu1 %641 }
 0x170   : > { %1412 = vpow2.f32 %v665_v47  ;;  %v663_v50 = vmul.f32 1.442695, %v655_v48  ;;  %v658_v51 = vsub.f32 %v625_v24, %v642_v49 }
 0x171   : > { %v639_v52 = vpop.xlane.xlu0 %638 }
 0x172   : > { %1414 = vpow2.f32 %v663_v50  ;;  %v669_v53 = vmul.f32 1.442695, %v658_v51  ;;  %v657_v54 = vsub.f32 %v624_v29, %v639_v52 }
 0x173   : > { %v651_v55 = vpop.xlane.xlu1 %650 }
 0x174   : > { %1416 = vpow2.f32 %v669_v53  ;;  %v667_v56 = vmul.f32 1.442695, %v657_v54  ;;  %v661_v57 = vsub.f32 %v628_v36, %v651_v55 }
 0x175   : > { %v645_v58 = vpop.xlane.xlu0 %644 }
 0x176   : > { %1418 = vpow2.f32 %v667_v56  ;;  %v675_v59 = vmul.f32 1.442695, %v661_v57  ;;  %v659_v60 = vsub.f32 %v626_v35, %v645_v58 }
 0x177   : > { %v654_v61 = vpop.xlane.xlu1 %653 }
 0x178   : > { %v671_v62 = vmul.f32 1.442695, %v659_v60  ;;  %v662_v63 = vsub.f32 %v629_v39, %v654_v61  ;;  %1420 = vpow2.f32 %v675_v59  ;;  %v731_v60 = vlaneseq }
 0x179   : > { %v648_v0 = vpop.xlane.xlu0 %647 }
 0x17a   : > { %1422 = vpow2.f32 %v671_v62  ;;  %v677_v1 = vmul.f32 1.442695, %v662_v63  ;;  %v660_v2 = vsub.f32 %v627_v41, %v648_v0  ;;  %v732_v61 = vshrl.u32 %v731_v60, 7 }
 0x17b   : > { %v734_v62 = vand.u32 127, %v731_v60  ;;  %v1560_v0 = vmov 0.0  }
 0x17c   : > { %v673_v3 = vmul.f32 1.442695, %v660_v2  ;;  %1424 = vpow2.f32 %v677_v1  ;;  %v735_v63 = vmul.u32 9, %v732_v61 }
 0x17d   : > { %v1413_v4 = vpop.eup %1412 }
 0x17e   : > { %1426 = vpow2.f32 %v673_v3  ;;  %v682_v5 = vsel %vm630_vm2, %v1413_v4, 0.0  ;;  %vm736_vm3 = vcmp.eq.s32.totalorder %v734_v62, %v735_v63 }
 0x17f   : > { %v1415_v6 = vpop.eup %1414  ;;  %683 = vadd.xlane.f32.xlu0 %v682_v5  ;;  %v1275_v1 = vsel %vm736_vm3, 1.0, %v1560_v0 }
 0x180   : > { %v679_v9 = vsel %vm630_vm2, %v1415_v6, 0.0  ;;  %1343 = vmatprep.subr.msk.mxu0 %vm804_vm4, %v1275_v1  ;;  %v740_v2 = vsel %vm739_vm5, %v1275_v1, 0.0 }
 0x181   : > { %v1417_v7 = vpop.eup %1416  ;;  %1344 = vmatpush3.msk.msra.mxu0 %vm804_vm4, %v1275_v1  ;;  %v741_v3 = vrot.slane %v740_v2, 4 }
 0x182   : > { %v688_v8 = vsel %vm630_vm2, %v1417_v7, 0.0 }
 0x183   : > { %v1419_v10 = vpop.eup %1418  ;;  %689 = vadd.xlane.f32.xlu1 %v688_v8  ;;  %680 = vadd.xlane.f32.xlu0 %v679_v9 }
 0x184   : > { %v685_v12 = vsel %vm630_vm2, %v1419_v10, 0.0 }
 0x185   : > { %v1421_v11 = vpop.eup %1420 }
 0x186   : > { %v697_v16 = vsel %vm630_vm2, %v1421_v11, 0.0 }
 0x187   : > { %v1423_v13 = vpop.eup %1422  ;;  %686 = vadd.xlane.f32.xlu1 %v685_v12 }
 0x188   : > { %v691_v14 = vsel %vm630_vm2, %v1423_v13, 0.0 }
 0x189   : > { %692 = vadd.xlane.f32.xlu0 %v691_v14  ;;  %v1425_v15 = vpop.eup %1424 }
 0x18a   : > { %v700_v19 = vsel %vm630_vm2, %v1425_v15, 0.0 }
 0x18b   : > { %v1427_v17 = vpop.eup %1426  ;;  %698 = vadd.xlane.f32.xlu1 %v697_v16 }
 0x18c   : > { %v694_v18 = vsel %vm630_vm2, %v1427_v17, 0.0 }
 0x18d   : > { %695 = vadd.xlane.f32.xlu0 %v694_v18 }
 0x18f   : > { %701 = vadd.xlane.f32.xlu1 %v700_v19 }
 0x208   : > { %v684_v20 = vpop.xlane.xlu0 %683 }
 0x209   : > { %1428 = vrcp.f32 %v684_v20 }
 0x20c   : > { %v690_v21 = vpop.xlane.xlu1 %689  ;;  %v681_v22 = vpop.xlane.xlu0 %680 }
 0x20d   : > { %1430 = vrcp.f32 %v690_v21 }
 0x20e   : > { %1432 = vrcp.f32 %v681_v22 }
 0x210   : > { %v687_v23 = vpop.xlane.xlu1 %686 }
 0x211   : > { %1434 = vrcp.f32 %v687_v23 }
 0x212   : > { %v693_v24 = vpop.xlane.xlu0 %692 }
 0x213   : > { %1436 = vrcp.f32 %v693_v24 }
 0x214   : > { %v699_v25 = vpop.xlane.xlu1 %698 }
 0x215   : > { %1438 = vrcp.f32 %v699_v25 }
 0x216   : > { %v1429_v26 = vpop.eup %1428  ;;  %v696_v27 = vpop.xlane.xlu0 %695 }
 0x217   : > { %1440 = vrcp.f32 %v696_v27  ;;  %v712_v29 = vmul.f32 %v1429_v26, %v1413_v4  ;;  %v742_v4 = vadd.f32 %v741_v3, %v740_v2 }
 0x218   : > { %v702_v28 = vpop.xlane.xlu1 %701 }
 0x219   : > { %1442 = vrcp.f32 %v702_v28  ;;  %v722_v33 = vsel %vm630_vm2, %v712_v29, -inf }
 0x21a   : > { %v1431_v30 = vpop.eup %1430 }
 0x21b   : > { %v1433_v31 = vpop.eup %1432  ;;  %v714_v32 = vmul.f32 %v1431_v30, %v1417_v7  ;;  %v743_v7 = vrot.slane %v742_v4, 2 }
 0x21c   : > { %v711_v35 = vmul.f32 %v1433_v31, %v1415_v6 }
 0x21d   : > { %v723_v34 = vsel %vm630_vm2, %v714_v32, -inf  ;;  %v744_v14 = vadd.f32 %v743_v7, %v742_v4 }
 0x21e   : > { %v1435_v36 = vpop.eup %1434  ;;  %v724_v37 = vmax.f32 %v722_v33, %v723_v34  ;;  %v719_v41 = vsel %vm630_vm2, %v711_v35, -inf }
 0x21f   : > { %v713_v38 = vmul.f32 %v1435_v36, %v1419_v10  ;;  %v745_v21 = vrot.slane %v744_v14, 1 }
 0x220   : > { %v1437_v39 = vpop.eup %1436  ;;  %v750_v40 = vsel %vm630_vm2, %v724_v37, -inf }
 0x221   : > { %751 = vmax.xlane.f32.xlu1 %v750_v40  ;;  %v720_v42 = vsel %vm630_vm2, %v713_v38, -inf  ;;  %v715_v43 = vmul.f32 %v1437_v39, %v1423_v13  ;;  %v746_v28 = vadd.f32 %v745_v21, %v744_v14 }
 0x222   : > { %v1439_v44 = vpop.eup %1438  ;;  %v721_v45 = vmax.f32 %v719_v41, %v720_v42 }
 0x223   : > { %v717_v46 = vmul.f32 %v1439_v44, %v1421_v11  ;;  %v725_v49 = vsel %vm630_vm2, %v715_v43, -inf  ;;  %v787_v33 = vsub.f32 1.0, %v746_v28 }
 0x224   : > { %v1441_v47 = vpop.eup %1440  ;;  %v747_v48 = vsel %vm630_vm2, %v721_v45, -inf }
 0x225   : > { %748 = vmax.xlane.f32.xlu0 %v747_v48  ;;  %v726_v50 = vsel %vm630_vm2, %v717_v46, -inf  ;;  %v716_v51 = vmul.f32 %v1441_v47, %v1427_v17 }
 0x226   : > { %v1443_v52 = vpop.eup %1442  ;;  %v727_v53 = vmax.f32 %v725_v49, %v726_v50  ;;  %v926_v50 = vld [vmem:[%s1718_s12 + $0x8] sm:$0xff] }
 0x227   : > { %v718_v54 = vmul.f32 %v1443_v52, %v1425_v15  ;;  %v728_v56 = vsel %vm630_vm2, %v716_v51, -inf  ;;  %1351 = vmatprep.subr.mxu1 %v926_v50  ;;  %v925_v51 = vld [vmem:[%s1718_s12] sm:$0xff]  ;;  %v928_v52 = vld [vmem:[%s1718_s12 + $0x18] sm:$0xff] }
 0x228   : > { %v753_v55 = vsel %vm630_vm2, %v727_v53, -inf  ;;  %1352 = vmatpush3.msra.mxu1 %v926_v50 }
 0x229   : > { %754 = vmax.xlane.f32.xlu0 %v753_v55  ;;  %v729_v57 = vsel %vm630_vm2, %v718_v54, -inf  ;;  %1353 = vmatprep.subr.mxu1 %v925_v51 }
 0x22a   : > { %v730_v58 = vmax.f32 %v728_v56, %v729_v57  ;;  %1354 = vmatpush3.msra.mxu1 %v925_v51 }
 0x22b   : > { %1358 = vmatprep.subr.mxu1 %v928_v52 }
 0x22c   : > { %v756_v59 = vsel %vm630_vm2, %v730_v58, -inf }
 0x22d   : > { %757 = vmax.xlane.f32.xlu1 %v756_v59 }
 0x2aa   : > { %v752_v5 = vpop.xlane.xlu1 %751 }
 0x2ab   : > { %v760_v6 = vmax.f32 %v752_v5, 0.0 }
 0x2ad   : > { %v764_v8 = vsub.f32 %v724_v37, %v760_v6  ;;  %v776_v9 = vsub.f32 0.0, %v760_v6 }
 0x2ae   : > { %v749_v10 = vpop.xlane.xlu0 %748 }
 0x2af   : > { %v769_v11 = vmul.f32 1.442695, %v764_v8  ;;  %v781_v12 = vmul.f32 1.442695, %v776_v9  ;;  %v759_v13 = vmax.f32 %v749_v10, 0.0  ;;  %v927_v10 = vld [vmem:[%s1718_s12 + $0x10] sm:$0xff] }
 0x2b1   : > { %1444 = vpow2.f32 %v769_v11  ;;  %v763_v15 = vsub.f32 %v721_v45, %v759_v13  ;;  %v775_v16 = vsub.f32 0.0, %v759_v13 }
 0x2b2   : > { %1446 = vpow2.f32 %v781_v12  ;;  %v755_v17 = vpop.xlane.xlu0 %754 }
 0x2b3   : > { %v767_v18 = vmul.f32 1.442695, %v763_v15  ;;  %v779_v19 = vmul.f32 1.442695, %v775_v16  ;;  %v761_v20 = vmax.f32 %v755_v17, 0.0 }
 0x2b5   : > { %1448 = vpow2.f32 %v767_v18  ;;  %v765_v22 = vsub.f32 %v727_v53, %v761_v20  ;;  %v777_v23 = vsub.f32 0.0, %v761_v20 }
 0x2b6   : > { %1450 = vpow2.f32 %v779_v19  ;;  %v758_v24 = vpop.xlane.xlu1 %757 }
 0x2b7   : > { %v771_v25 = vmul.f32 1.442695, %v765_v22  ;;  %v783_v26 = vmul.f32 1.442695, %v777_v23  ;;  %v762_v27 = vmax.f32 %v758_v24, 0.0 }
 0x2b9   : > { %1452 = vpow2.f32 %v771_v25  ;;  %v766_v29 = vsub.f32 %v730_v58, %v762_v27  ;;  %v778_v30 = vsub.f32 0.0, %v762_v27 }
 0x2ba   : > { %1454 = vpow2.f32 %v783_v26 }
 0x2bb   : > { %v773_v31 = vmul.f32 1.442695, %v766_v29  ;;  %v785_v32 = vmul.f32 1.442695, %v778_v30 }
 0x2bd   : > { %1456 = vpow2.f32 %v773_v31 }
 0x2be   : > { %v1445_v34 = vpop.eup %1444  ;;  %1458 = vpow2.f32 %v785_v32 }
 0x2bf   : > { %v1447_v35 = vpop.eup %1446  ;;  %v896_v36 = vsel %vm630_vm2, %v1445_v34, 0.0 }
 0x2c0   : > { %897 = vadd.xlane.f32.xlu1 %v896_v36  ;;  %v789_v37 = vmul.f32 %v1447_v35, %v787_v33  ;;  %v906_v54 = vmul.f32 14.0, %v1447_v35 }
 0x2c2   : > { %v1449_v38 = vpop.eup %1448 }
 0x2c3   : > { %v1451_v39 = vpop.eup %1450  ;;  %1345 = vmatprep.mubr.msk.f32.mxu0 %vm630_vm2, %v1449_v38  ;;  %v893_v40 = vsel %vm630_vm2, %v1449_v38, 0.0 }
 0x2c4   : > { %894 = vadd.xlane.f32.xlu0 %v893_v40  ;;  %1346 = vmatmul.mubr.msk.f32.vlgmr.msra.gmra.mxu0 %vm630_vm2, %v1445_v34  ;;  %v788_v41 = vmul.f32 %v1451_v39, %v787_v33  ;;  %v905_v57 = vmul.f32 14.0, %v1451_v39 }
 0x2c6   : > { %v1453_v42 = vpop.eup %1452 }
 0x2c7   : > { %v1455_v43 = vpop.eup %1454  ;;  %1348 = vmatprep.mubr.msk.f32.mxu0 %vm630_vm2, %v1453_v42  ;;  %v899_v44 = vsel %vm630_vm2, %v1453_v42, 0.0 }
 0x2c8   : > { %900 = vadd.xlane.f32.xlu0 %v899_v44  ;;  %v790_v45 = vmul.f32 %v1455_v43, %v787_v33  ;;  %v907_v62 = vmul.f32 14.0, %v1455_v43 }
 0x2ca   : > { %v1457_v46 = vpop.eup %1456 }
 0x2cb   : > { %v1459_v47 = vpop.eup %1458  ;;  %1349 = vmatmul.mubr.msk.f32.gmra.mxu0 %vm630_vm2, %v1457_v46  ;;  %v902_v48 = vsel %vm630_vm2, %v1457_v46, 0.0 }
 0x2cc   : > { %903 = vadd.xlane.f32.xlu1 %v902_v48  ;;  %v791_v49 = vmul.f32 %v1459_v47, %v787_v33  ;;  %v908_v60 = vmul.f32 14.0, %v1459_v47 }
 0x349   : > { %v898_v53 = vpop.xlane.xlu1 %897 }
 0x34a   : > { %v910_v56 = vadd.f32 %v906_v54, %v898_v53 }
 0x34c   : > { %1460 = vrcp.f32 %v910_v56 }
 0x34d   : > { %v895_v55 = vpop.xlane.xlu0 %894 }
 0x34e   : > { %v909_v58 = vadd.f32 %v905_v57, %v895_v55 }
 0x350   : > { %1462 = vrcp.f32 %v909_v58 }
 0x351   : > { %v901_v61 = vpop.xlane.xlu0 %900 }
 0x352   : > { %v911_v0 = vadd.f32 %v907_v62, %v901_v61 }
 0x355   : > { %v904_v59 = vpop.xlane.xlu1 %903 }
 0x356   : > { %v912_v63 = vadd.f32 %v908_v60, %v904_v59 }
 0x358   : > { %1464 = vrcp.f32 %v912_v63 }
 0x359   : > { %1466 = vrcp.f32 %v911_v0  ;;  %v1461_v3 = vpop.eup %1460 }
 0x35d   : > { %v1463_v7 = vpop.eup %1462 }
 0x365   : > { %v1465_v12 = vpop.eup %1464 }
 0x366   : > { %v1467_v16 = vpop.eup %1466 }
 0x384   : > { %v1347_v1 = vpop.f32.mrf.mxu0 }
 0x385   : > { %v880_v2 = vadd.f32 %v1347_v1, %v789_v37 }
 0x386   : > { %v874_v4 = vpop.f32.mrf.mxu0 }
 0x387   : > { %v918_v5 = vmul.f32 %v1461_v3, %v880_v2  ;;  %v875_v6 = vadd.f32 %v874_v4, %v788_v41 }
 0x389   : > { %922 = vst.msk [vmem:[%s240_s20 + $0x8] sm:$0xff] %vm285_vm1, %v918_v5  ;;  %v917_v8 = vmul.f32 %v1463_v7, %v875_v6 }
 0x38b   : > { %921 = vst.msk [vmem:[%s240_s20] sm:$0xff] %vm285_vm1, %v917_v8  ;;  %v1350_v9 = vpop.f32.mrf.mxu0  ;;  %1355 = vmatprep.mubr.msk.f32.mxu1 %vm285_vm1, %v917_v8 }
 0x38c   : > { %v890_v11 = vadd.f32 %v1350_v9, %v791_v49  ;;  %1356 = vmatmul.mubr.msk.f32.vlgmr.msra.gmra.mxu1 %vm285_vm1, %v918_v5 }
 0x38d   : > { %v884_v13 = vpop.f32.mrf.mxu0  ;;  %1359 = vmatpush3.msra.mxu1 %v928_v52 }
 0x38e   : > { %v920_v14 = vmul.f32 %v1465_v12, %v890_v11  ;;  %v885_v15 = vadd.f32 %v884_v13, %v790_v45  ;;  %1360 = vmatprep.subr.mxu1 %v927_v10 }
 0x38f   : > { %1361 = vmatpush3.msra.mxu1 %v927_v10 }
 0x390   : > { %924 = vst.msk [vmem:[%s240_s20 + $0x18] sm:$0xff] %vm285_vm1, %v920_v14  ;;  %v919_v17 = vmul.f32 %v1467_v16, %v885_v15 }
 0x392   : > { %923 = vst.msk [vmem:[%s240_s20 + $0x10] sm:$0xff] %vm285_vm1, %v919_v17  ;;  %1362 = vmatprep.mubr.msk.f32.mxu1 %vm285_vm1, %v919_v17 }
 0x393   : > { %1363 = vmatmul.mubr.msk.f32.vlgmr.msra.gmra.mxu1 %vm285_vm1, %v920_v14 }
 0x394   : > { %1481 = shalt.err (!%p1478_p3)
}
 0x395   : > { %s1482_s9 = scalar_lea.hbm %s1744_s29, 512  ;;  %s1486_s12 = scalar_lea.hbm %s1834_s4, 1024 }
 0x396   : > { %p1483_p4 = scmp.ne.s32.totalorder %s1744_s29, %s1482_s9  ;;  %p1487_p9 = scmp.lt.s32.totalorder %s1744_s29, %s1834_s4 }
 0x397   : > { %p1488_p10 = scmp.lt.s32.totalorder %s1486_s12, %s1482_s9 }
 0x398   : > { %p1484_p7 = pnand %p1483_p4, %p1628_p5 }
 0x399   : > { %p1489_p11 = por %p1488_p10, %p1487_p9 }
 0x39a   : > { %p1485_p8 = pneg %p1484_p7 }
 0x39c   : > { %p1490_p12 = pnand %p1489_p11, %p1485_p8 }
 0x39e   : > { %1493 = shalt.err (!%p1490_p12)
}
 0x39f   : > { %s1562_s28 = smov 128   ;;  %s1563_s5 = smov 8  }
 0x3a0   : > { %1366 = dma.vmem_to_hbm [thread:$0]  (%p1628_p5), %s1746_s22, 512, %s1744_s29, %s1101_s30, %s1562_s28, %s1562_s28, %s1563_s5  }
 0x3a1   : > { %s233_s6 = scalar_lea.vmem [#allocation2], %s1252_s14  ;;  %s1786_s30 = scalar_lea.hbm %s1833_s3, %s1296_s23 }
 0x3a2   : > { %s1114_s7 = sshll.u32 %s233_s6, 4  ;;  %s1096_s14 = scalar_lea.sflag [#allocation3], %s1724_s13  ;;  %s1778_s7 = int_to_ptr.vmem [resolvable:$true] %s1114_s7 }
 0x3a3   : > { %s1494_s8 = scalar_lea.vmem %s1778_s7, 512  ;;  %s1564_s9 = smov [#allocation2]  }
 0x3a4   : > { %p1495_p13 = scmp.ne.s32.totalorder %s1778_s7, %s1494_s8  ;;  %s1498_s10 = sshll.u32 %s1564_s9, 4  ;;  %s1499_s10 = int_to_ptr.vmem [resolvable:$false] %s1498_s10 }
 0x3a5   : > { %s1500_s11 = scalar_lea.vmem %s1499_s10, 1024  ;;  %p1501_p2 = scmp.lt.s32.totalorder %s1778_s7, %s1499_s10 }
 0x3a6   : > { %p1496_p0 = pnand %p1495_p13, %p1628_p5  ;;  %p1502_p3 = scmp.lt.s32.totalorder %s1500_s11, %s1494_s8 }
 0x3a8   : > { %p1497_p1 = pneg %p1496_p0  ;;  %p1503_p4 = por %p1502_p3, %p1501_p2 }
 0x3aa   : > { %p1504_p7 = pnand %p1503_p4, %p1497_p1 }
 0x44c   : > { %v1357_v18 = vpop.f32.mrf.mxu1 }
 0x44d   : > { %1092 = vst.msk [vmem:[%s233_s6 + $0x8] sm:$0xff] %vm285_vm1, %v1357_v18 }
 0x44e   : > { %v1001_v19 = vpop.f32.mrf.mxu1 }
 0x44f   : > { %1091 = vst.msk [vmem:[%s233_s6] sm:$0xff] %vm285_vm1, %v1001_v19 }
 0x453   : > { %v1364_v20 = vpop.f32.mrf.mxu1 }
 0x454   : > { %1094 = vst.msk [vmem:[%s233_s6 + $0x18] sm:$0xff] %vm285_vm1, %v1364_v20 }
 0x455   : > { %v1082_v21 = vpop.f32.mrf.mxu1 }
 0x456   : > { %1093 = vst.msk [vmem:[%s233_s6 + $0x10] sm:$0xff] %vm285_vm1, %v1082_v21 }
 0x457   : > { %1507 = shalt.err (!%p1504_p7)
}
 0x458   : > { %s1508_s19 = scalar_lea.hbm %s1786_s30, 512  ;;  %s1512_s12 = scalar_lea.hbm %s1833_s3, 1024 }
 0x459   : > { %p1509_p8 = scmp.ne.s32.totalorder %s1786_s30, %s1508_s19  ;;  %p1513_p11 = scmp.lt.s32.totalorder %s1786_s30, %s1833_s3 }
 0x45a   : > { %p1514_p12 = scmp.lt.s32.totalorder %s1512_s12, %s1508_s19 }
 0x45b   : > { %p1510_p9 = pnand %p1509_p8, %p1628_p5 }
 0x45c   : > { %p1515_p13 = por %p1514_p12, %p1513_p11 }
 0x45d   : > { %p1511_p10 = pneg %p1510_p9 }
 0x45f   : > { %p1516_p0 = pnand %p1515_p13, %p1511_p10 }
 0x461   : > { %1519 = shalt.err (!%p1516_p0)
}
 0x462   : > { %1365 = dma.vmem_to_hbm [thread:$0]  (%p1628_p5), %s1778_s7, 512, %s1786_s30, %s1096_s14, %s1562_s28, %s1562_s28, %s1563_s5  }
 0x463 PF: > { %p1376_p1 = scmp.ge.s32.totalorder %s1558_s18, 2  ;;  %s1145_s6 = sand.u32 1, %s1546_s15  }
 0x464   : > { %s1146_s22 = scalar_lea.sflag [#allocation3], %s1145_s6 }
 0x465   : > { %p1370_p2 = pnand %p1376_p1, %p1632_p6 }
 0x467   : > { %p1371_p3 = pneg %p1370_p2 }
 0x469   : > { %1537 = dma.done.wait (%p1371_p3), %s1146_s22, 512  }
 0x46a   : > { %1539 = vsyncadd (%p1371_p3), %s1146_s22, 4294966784  ;;  %s1155_s29 = scalar_lea.sflag [#allocation5], %s1145_s6 }
 0x46b   : > { %1541 = dma.done.wait (%p1371_p3), %s1155_s29, 512  }
 0x46c   : > { %1543 = vsyncadd (%p1371_p3), %s1155_s29, 4294966784  ;;  %p18_p5 = scmp.ge.s32.totalorder %s1615_s21, 4   ;;  %s1837_s15 = smov %s1550_s16 }
 0x46d   : > { %s1838_s16 = smov %s1554_s17  ;;  %s1839_s17 = smov %s1626_s24 }
 0x46e   : > { %s1840_s18 = smov %s1615_s21  ;;  %20 = sbr.rel (!%p18_p5) target bundleno = 5 (0x5), region = 90 }
 0x473   :  { %1160 = vsyncpa [#allocation3], 1 }
 0x474   :  { %1162 = vsyncpa [#allocation3 + $0x1], 1 }
 0x475   :  { %1163 = vsyncpa [#allocation5], 1 }
 0x476   :  { %1165 = vsyncpa [#allocation5 + $0x1], 1 }

</bundles_post_ra>
